<compile_context>
chip_gen: v7x
topology: tpu7x:2x2x1
jax: 0.10.0
libtpu: 0.0.40
codegen_flags: <defaults>
</compile_context>

<pallas_src>
import functools
import numpy as np
import jax
import jax.numpy as jnp
from jax.experimental import pallas as pl
from jax.experimental.pallas import tpu as pltpu

SUBLANE = 8
LANE = 128
COMPUTE_DTYPE = jnp.bfloat16     # MXU operand dtype (f32 accumulation everywhere)
_EPS = 1e-5

_TAPS27 = [(kz, ky, kx) for kz in (-1, 0, 1) for ky in (-1, 0, 1) for kx in (-1, 0, 1)]


# -----------------------------------------------------------------------------
# small helpers
# -----------------------------------------------------------------------------
def _round_up(x, m):
    return (x + m - 1) // m * m


def _pad_to(a, axis, target):
    pad = target - a.shape[axis]
    if pad <= 0:
        return a
    widths = [(0, 0)] * a.ndim
    widths[axis] = (0, pad)
    return jnp.pad(a, widths)


_VMEM_LIMIT_CACHE = [None]


def _vmem_limit():
    """Per-generation VMEM budget (<=48 MiB on v7x, <=96 MiB on v5e/v6e)."""
    if _VMEM_LIMIT_CACHE[0] is None:
        try:
            cap = int(pltpu.get_tpu_info().vmem_capacity_bytes)
        except Exception:
            cap = 64 * 1024 * 1024            # conservative fallback = v7x physical
        _VMEM_LIMIT_CACHE[0] = min(int(cap * 3 // 4), 96 * 1024 * 1024)
    return _VMEM_LIMIT_CACHE[0]


def _cparams(sem):
    return pltpu.CompilerParams(dimension_semantics=sem,
                                vmem_limit_bytes=_vmem_limit())


def _choose_tile_m(tile_m, K, Cp, budget):
    tile_m = max(SUBLANE, (tile_m // SUBLANE) * SUBLANE)
    # live bytes ~ 2 double-buffered (x,y) tiles + 2x the resident weight
    while tile_m > SUBLANE and 8 * tile_m * (K + Cp) + 8 * K * Cp > budget:
        tile_m //= 2
    return max(SUBLANE, (tile_m // SUBLANE) * SUBLANE)


# -----------------------------------------------------------------------------
# Pallas kernels
# -----------------------------------------------------------------------------
def _fused_bn_block_kernel(x_ref, w_ref, g_ref, bt_ref, o_ref, *, slope, eps, inv_m):
    """Single-block: matmul + train-mode BN (full-M stats in VMEM) + LeakyReLU."""
    x = x_ref[...].astype(COMPUTE_DTYPE)
    w = w_ref[...].astype(COMPUTE_DTYPE)
    y = jnp.dot(x, w, preferred_element_type=jnp.float32)
    mean = jnp.sum(y, axis=0, keepdims=True) * inv_m
    var = jnp.maximum(jnp.sum(y * y, axis=0, keepdims=True) * inv_m - mean * mean, 0.0)
    scale = g_ref[...] * jax.lax.rsqrt(var + eps)        # fold gamma * rsqrt
    shift = bt_ref[...] - mean * scale                   # bias is a no-op under BN
    z = y * scale + shift
    o_ref[...] = jnp.where(z > 0, z, slope * z)


def _mm_stats_kernel(x_ref, w_ref, y_ref, s1_ref, s2_ref, acc1, acc2):
    """Pass 1 (tiled over M, 'arbitrary'): y tile + per-channel sum / sum-of-squares."""
    i = pl.program_id(0)
    x = x_ref[...].astype(COMPUTE_DTYPE)
    w = w_ref[...].astype(COMPUTE_DTYPE)
    y = jnp.dot(x, w, preferred_element_type=jnp.float32)
    y_ref[...] = y

    @pl.when(i == 0)
    def _():
        acc1[...] = jnp.zeros_like(acc1)
        acc2[...] = jnp.zeros_like(acc2)

    acc1[...] += jnp.sum(y, axis=0, keepdims=True)
    acc2[...] += jnp.sum(y * y, axis=0, keepdims=True)

    @pl.when(i == pl.num_programs(0) - 1)
    def _():
        s1_ref[...] = acc1[...]
        s2_ref[...] = acc2[...]


def _scale_act_kernel(y_ref, sc_ref, sh_ref, o_ref, *, slope):
    """Pass 2 (tiled over M, 'parallel'): fused scale+shift+LeakyReLU."""
    z = y_ref[...] * sc_ref[...] + sh_ref[...]
    o_ref[...] = jnp.where(z > 0, z, slope * z)


def _backbone_kernel(x_ref, tw_ref, tb_ref, hw_ref, hg_ref, hb_ref, o_ref, *,
                     slope, eps, inv_m):
    """Per-frame (grid over T): trunk matmul+bias+ReLU chained with head
    1x1 + per-frame BatchNorm2d (train stats) + LeakyReLU, all on the VMEM tile."""
    x = x_ref[0].astype(COMPUTE_DTYPE)                                  # [Mf, Kt]
    t = jnp.dot(x, tw_ref[...].astype(COMPUTE_DTYPE),
                preferred_element_type=jnp.float32)
    t = jnp.maximum(t + tb_ref[...], 0.0)                               # trunk ReLU
    h = jnp.dot(t.astype(COMPUTE_DTYPE), hw_ref[...].astype(COMPUTE_DTYPE),
                preferred_element_type=jnp.float32)
    mean = jnp.sum(h, axis=0, keepdims=True) * inv_m
    var = jnp.maximum(jnp.sum(h * h, axis=0, keepdims=True) * inv_m - mean * mean, 0.0)
    scale = hg_ref[...] * jax.lax.rsqrt(var + eps)
    shift = hb_ref[...] - mean * scale
    z = h * scale + shift
    o_ref[0] = jnp.where(z > 0, z, slope * z)


# -----------------------------------------------------------------------------
# fused Conv (as matmul) + train-mode BatchNorm + LeakyReLU wrapper
# -----------------------------------------------------------------------------
def conv_bn_act(x2d, w, g, bt, *, slope=0.0, eps=_EPS, tile_m=512):
    """y = LeakyReLU(slope)( BN_train( x2d @ w ) * g + bt ), BN over all M rows."""
    M, K = x2d.shape
    Kw, Cout = w.shape
    assert K == Kw, (K, Kw)
    Cp = _round_up(Cout, LANE)                      # lane-dense output channels
    w_p = _pad_to(w, 1, Cp)
    g_p = _pad_to(g, 1, Cp)
    bt_p = _pad_to(bt, 1, Cp)
    budget = _vmem_limit()
    tile_m = _choose_tile_m(tile_m, K, Cp, budget)

    Mp_sub = _round_up(M, SUBLANE)
    if Mp_sub <= tile_m:
        # ---- small problem: keep y resident, BN in-block (single fused kernel) ----
        x_p = _pad_to(x2d, 0, Mp_sub)
        out = pl.pallas_call(
            functools.partial(_fused_bn_block_kernel, slope=slope, eps=eps, inv_m=1.0 / M),
            out_shape=jax.ShapeDtypeStruct((Mp_sub, Cp), jnp.float32),
            grid=(1,),
            in_specs=[pl.BlockSpec((Mp_sub, K), lambda i: (0, 0)),
                      pl.BlockSpec((K, Cp), lambda i: (0, 0)),
                      pl.BlockSpec((1, Cp), lambda i: (0, 0)),
                      pl.BlockSpec((1, Cp), lambda i: (0, 0))],
            out_specs=pl.BlockSpec((Mp_sub, Cp), lambda i: (0, 0)),
            compiler_params=_cparams(("arbitrary",)),
        )(x_p, w_p, g_p, bt_p)
        return out[:M, :Cout]

    # ---- general path: two-pass tiled over M (pipelined, cross-tile BN stats) ----
    Mp = _round_up(M, tile_m)
    x_p = _pad_to(x2d, 0, Mp)                       # zero rows; bias skipped -> stats exact
    nt = Mp // tile_m

    y, s1, s2 = pl.pallas_call(
        _mm_stats_kernel,
        out_shape=(jax.ShapeDtypeStruct((Mp, Cp), jnp.float32),
                   jax.ShapeDtypeStruct((1, Cp), jnp.float32),
                   jax.ShapeDtypeStruct((1, Cp), jnp.float32)),
        grid=(nt,),
        in_specs=[pl.BlockSpec((tile_m, K), lambda i: (i, 0)),
                  pl.BlockSpec((K, Cp), lambda i: (0, 0))],
        out_specs=(pl.BlockSpec((tile_m, Cp), lambda i: (i, 0)),
                   pl.BlockSpec((1, Cp), lambda i: (0, 0)),
                   pl.BlockSpec((1, Cp), lambda i: (0, 0))),
        scratch_shapes=[pltpu.VMEM((1, Cp), jnp.float32),
                        pltpu.VMEM((1, Cp), jnp.float32)],
        compiler_params=_cparams(("arbitrary",)),
    )(x_p, w_p)

    mean = s1 * (1.0 / M)
    var = jnp.maximum(s2 * (1.0 / M) - mean * mean, 0.0)
    scale = g_p * jax.lax.rsqrt(var + eps)
    shift = bt_p - mean * scale

    out = pl.pallas_call(
        functools.partial(_scale_act_kernel, slope=slope),
        out_shape=jax.ShapeDtypeStruct((Mp, Cp), jnp.float32),
        grid=(nt,),
        in_specs=[pl.BlockSpec((tile_m, Cp), lambda i: (i, 0)),
                  pl.BlockSpec((1, Cp), lambda i: (0, 0)),
                  pl.BlockSpec((1, Cp), lambda i: (0, 0))],
        out_specs=pl.BlockSpec((tile_m, Cp), lambda i: (i, 0)),
        compiler_params=_cparams(("parallel",)),
    )(y, scale, shift)
    return out[:M, :Cout]


# -----------------------------------------------------------------------------
# glue: trace-time tap pruning for dilated 3x3x3 "same" convs (padding==dilation)
# -----------------------------------------------------------------------------
def _shift_zero(x, s, axis):
    """out[..., i, ...] = x[..., i + s, ...], zeros where out of bounds."""
    size = x.shape[axis]
    if s == 0:
        return x
    if abs(s) >= size:
        return jnp.zeros_like(x)
    pad = [(0, 0)] * x.ndim
    if s > 0:
        sl = jax.lax.slice_in_dim(x, s, size, axis=axis)
        pad[axis] = (0, s)
    else:
        sl = jax.lax.slice_in_dim(x, 0, size + s, axis=axis)
        pad[axis] = (-s, 0)
    return jnp.pad(sl, pad)


def _shifted(x, shift):
    dz, dy, dx = shift
    t = _shift_zero(x, dz, 1)
    t = _shift_zero(t, dy, 2)
    t = _shift_zero(t, dx, 3)
    return t


def _build_patches(x, shifts):
    """Concatenate the live shifted taps along channels (no copy for the 1x1 case)."""
    if len(shifts) == 1 and shifts[0] == (0, 0, 0):
        return x
    return jnp.concatenate([_shifted(x, s) for s in shifts], axis=-1)


def _live_taps(dil, D, H, W):
    """(tap_index, shift) pairs whose dilated shift stays inside the volume."""
    taps = []
    for ti, (kz, ky, kx) in enumerate(_TAPS27):
        if abs(kz) * dil < D and abs(ky) * dil < H and abs(kx) * dil < W:
            taps.append((ti, (kz * dil, ky * dil, kx * dil)))
    return taps


def conv_block_3x3(x, p, dil, *, slope=0.0):
    """3x3x3 dilated conv (padding==dilation) + BN + LeakyReLU on NDHWC features."""
    N, D, H, W, C = x.shape
    taps = _live_taps(dil, D, H, W)
    shifts = [s for _, s in taps]
    patches = _build_patches(x, shifts).reshape(N * D * H * W, len(shifts) * C)
    w = p['w']
    if len(taps) < 27:      # drop weight rows of all-zero taps at trace time
        w = jnp.concatenate([w[ti * C:(ti + 1) * C] for ti, _ in taps], axis=0)
    y = conv_bn_act(patches, w, p['g'], p['bt'], slope=slope)
    return y.reshape(N, D, H, W, -1)


# -----------------------------------------------------------------------------
# backbone: trunk stand-in + head, one pallas_call over all frames
# -----------------------------------------------------------------------------
def backbone_forward(x_ncdhw, p, cfg):
    N, C, T, H, W = x_ncdhw.shape
    S = cfg['stride']
    Hs, Ws = H // S, W // S
    Mf = N * Hs * Ws
    Kt = S * S * C
    c_mid, c_bb = cfg['c_mid'], cfg['c_bb']
    Cp = _round_up(c_bb, LANE)

    # [N,C,T,H,W] -> per-frame strided patchify -> [T, Mf, Kt]
    img = jnp.transpose(x_ncdhw, (2, 0, 3, 4, 1))                    # [T, N, H, W, C]
    img = img.reshape(T, N, Hs, S, Ws, S, C)
    patches = jnp.transpose(img, (0, 1, 2, 4, 3, 5, 6)).reshape(T, Mf, Kt)

    hw = _pad_to(p['head']['w'], 1, Cp)
    hg = _pad_to(p['head']['g'], 1, Cp)
    hb = _pad_to(p['head']['bt'], 1, Cp)

    out = pl.pallas_call(
        functools.partial(_backbone_kernel, slope=0.01, eps=_EPS, inv_m=1.0 / Mf),
        out_shape=jax.ShapeDtypeStruct((T, Mf, Cp), jnp.float32),
        grid=(T,),
        in_specs=[pl.BlockSpec((1, Mf, Kt), lambda t: (t, 0, 0)),
                  pl.BlockSpec((Kt, c_mid), lambda t: (0, 0)),
                  pl.BlockSpec((1, c_mid), lambda t: (0, 0)),
                  pl.BlockSpec((c_mid, Cp), lambda t: (0, 0)),
                  pl.BlockSpec((1, Cp), lambda t: (0, 0)),
                  pl.BlockSpec((1, Cp), lambda t: (0, 0))],
        out_specs=pl.BlockSpec((1, Mf, Cp), lambda t: (t, 0, 0)),
        compiler_params=_cparams(("parallel",)),
    )(patches, p['trunk']['w'], p['trunk']['b'], hw, hg, hb)

    xb = out[:, :, :c_bb].reshape(T, N, Hs, Ws, c_bb)
    return jnp.transpose(xb, (1, 0, 2, 3, 4))                        # [N, T, Hs, Ws, c_bb]


# -----------------------------------------------------------------------------
# ASSP encoder: all branches with the same live-tap pattern fused into one matmul
# -----------------------------------------------------------------------------
def assp_forward(xb, p):
    N, D, H, W, C = xb.shape
    M = N * D * H * W
    branch_defs = [('aspp_1x1', None), ('aspp_d6', 6), ('aspp_d12', 12),
                   ('aspp_d18', 18), ('aspp_d24', 24), ('aspp_pool', None),
                   ('aspp_d30', 30)]

    groups = {}           # shift-tuple -> {'shifts', 'w', 'g', 'bt', 'cols'}
    order = []            # (group_key, col_start, cout) per branch, in x1..x7 order
    for name, dil in branch_defs:
        if dil is None:
            plan = [((0, 0, 0), (0, C))]
        else:
            plan = [(s, (ti * C, (ti + 1) * C)) for ti, s in _live_taps(dil, D, H, W)]
        key = tuple(s for s, _ in plan)
        if key not in groups:
            groups[key] = dict(shifts=list(key), w=[], g=[], bt=[], cols=0)
        grp = groups[key]
        w = p[name]['w']
        w_rows = (jnp.concatenate([w[r0:r1] for _, (r0, r1) in plan], axis=0)
                  if len(plan) > 1 else w[plan[0][1][0]:plan[0][1][1]])
        grp['w'].append(w_rows)
        grp['g'].append(p[name]['g'])
        grp['bt'].append(p[name]['bt'])
        cout_b = w.shape[1]
        order.append((key, grp['cols'], cout_b))
        grp['cols'] += cout_b

    group_out = {}
    for key, grp in groups.items():
        patches = _build_patches(xb, grp['shifts']).reshape(M, len(grp['shifts']) * C)
        wg = jnp.concatenate(grp['w'], axis=1)
        gg = jnp.concatenate(grp['g'], axis=1)
        bg = jnp.concatenate(grp['bt'], axis=1)
        group_out[key] = conv_bn_act(patches, wg, gg, bg, slope=0.0)

    if len(groups) == 1:          # common case: fused output already in x1..x7 order
        xa_in = group_out[next(iter(groups))]
    else:
        xa_in = jnp.concatenate([group_out[key][:, c0:c0 + cn] for key, c0, cn in order],
                                axis=-1)

    # final 1x1 over the (already materialized as the fused output) 7-branch concat
    xa = conv_bn_act(xa_in, p['aspp_final']['w'], p['aspp_final']['g'],
                     p['aspp_final']['bt'], slope=0.0)
    return xa.reshape(N, D, H, W, -1)


# -----------------------------------------------------------------------------
# parameter init (synthetic; shapes follow the module structure)
# -----------------------------------------------------------------------------
def _init_block(key, k_in, c_out):
    kw, kb, kg, kbt = jax.random.split(key, 4)
    return dict(
        w=jax.random.normal(kw, (k_in, c_out), jnp.float32) / np.sqrt(k_in),
        b=0.1 * jax.random.normal(kb, (1, c_out), jnp.float32),
        g=1.0 + 0.1 * jax.random.normal(kg, (1, c_out), jnp.float32),
        bt=0.1 * jax.random.normal(kbt, (1, c_out), jnp.float32),
    )


def init_params(key, cfg):
    keys = jax.random.split(key, 16)
    S, C_IN = cfg['stride'], cfg['c_in']
    p = {}
    p['trunk'] = _init_block(keys[0], S * S * C_IN, cfg['c_mid'])    # ResNet-trunk stand-in
    p['trunk']['g'] = jnp.ones_like(p['trunk']['g'])
    p['trunk']['bt'] = jnp.zeros_like(p['trunk']['bt'])
    p['head'] = _init_block(keys[1], cfg['c_mid'], cfg['c_bb'])      # 1x1 conv + BN2d + LeakyReLU
    p['aspp_1x1'] = _init_block(keys[2], cfg['c_bb'], cfg['c_aspp'])
    p['aspp_d6'] = _init_block(keys[3], 27 * cfg['c_bb'], cfg['c_aspp'])
    p['aspp_d12'] = _init_block(keys[4], 27 * cfg['c_bb'], cfg['c_aspp'])
    p['aspp_d18'] = _init_block(keys[5], 27 * cfg['c_bb'], cfg['c_aspp'])
    p['aspp_d24'] = _init_block(keys[6], 27 * cfg['c_bb'], cfg['c_aspp'])
    p['aspp_d30'] = _init_block(keys[7], 27 * cfg['c_bb'], cfg['c_aspp'])
    p['aspp_pool'] = _init_block(keys[8], cfg['c_bb'], cfg['c_aspp'])
    p['aspp_final'] = _init_block(keys[9], 7 * cfg['c_aspp'], cfg['c_aspp'])
    p['conv1x1'] = _init_block(keys[10], cfg['c_aspp'], cfg['c_low'])
    p['conv3x3'] = _init_block(keys[11], 27 * (cfg['c_low'] + cfg['c_aspp']), cfg['c_dec'])
    p['classifier'] = _init_block(keys[12], cfg['c_dec'], cfg['num_classes'])
    return p


# -----------------------------------------------------------------------------
# Deeplabv3Plus forward
# -----------------------------------------------------------------------------
def deeplabv3plus_forward(x_ncdhw, p, cfg):
    xb = backbone_forward(x_ncdhw, p, cfg)            # [N, T, Hs, Ws, c_bb]
    xa = assp_forward(xb, p)                          # [N, T, Hs, Ws, c_aspp]

    N, D, H, W, C = xa.shape
    # conv1x1 commuted before the x4 nearest upsample (exact: 1x1 conv + train-BN
    # are invariant to uniform voxel repetition)
    xl = conv_bn_act(xa.reshape(-1, C), p['conv1x1']['w'], p['conv1x1']['g'],
                     p['conv1x1']['bt'], slope=0.0).reshape(N, D, H, W, -1)
    xc = jnp.concatenate([xl, xa], axis=-1)           # torch.cat([conv1x1, assp], dim=1)
    xc = jnp.repeat(jnp.repeat(xc, 4, axis=2), 4, axis=3)   # F.interpolate nearest (1,4,4)

    xd = conv_block_3x3(xc, p['conv3x3'], 1, slope=0.0)

    # classifier commuted before the x8 nearest upsample (exact, see above)
    Cc = xd.shape[-1]
    xo = conv_bn_act(xd.reshape(-1, Cc), p['classifier']['w'], p['classifier']['g'],
                     p['classifier']['bt'], slope=0.0).reshape(xd.shape[:-1] + (-1,))
    xo = jnp.repeat(jnp.repeat(xo, 8, axis=2), 8, axis=3)   # F.interpolate nearest (1,8,8)
    return jnp.transpose(xo, (0, 4, 1, 2, 3))               # back to NCDHW


# -----------------------------------------------------------------------------
if __name__ == "__main__":
    cfg = dict(c_in=3, stride=8,        # stand-in trunk stride (real ResNet101 layer3 is 16)
               c_mid=64,                # scaled analog of 1024
               c_bb=128,                # scaled analog of 2048
               c_aspp=32,               # scaled analog of 256
               c_low=8,                 # scaled analog of 48
               c_dec=32,                # scaled analog of 256
               num_classes=3)

    key = jax.random.PRNGKey(0)
    kx, kp = jax.random.split(key)
    N, T, H, W = 1, 2, 16, 16
    x = jax.random.normal(kx, (N, cfg['c_in'], T, H, W), jnp.float32)   # PyTorch NCDHW input
    params = init_params(kp, cfg)

    # --- self-check: tiled two-pass BN path vs single-block fused path ---
    xt = jax.random.normal(jax.random.PRNGKey(1), (600, 96), jnp.float32)
    wt = 0.1 * jax.random.normal(jax.random.PRNGKey(2), (96, 40), jnp.float32)
    gt = jnp.ones((1, 40), jnp.float32)
    bt0 = jnp.zeros((1, 40), jnp.float32)
    ref = conv_bn_act(xt, wt, gt, bt0, slope=0.01, tile_m=1024)   # single fused block
    tst = conv_bn_act(xt, wt, gt, bt0, slope=0.01, tile_m=256)    # tiled two-pass (3 tiles)
    ref, tst = jax.block_until_ready((ref, tst))
    assert jnp.allclose(ref, tst, atol=2e-2, rtol=2e-2), \
        float(jnp.max(jnp.abs(ref - tst)))

    out = jax.block_until_ready(deeplabv3plus_forward(x, params, cfg))

    expected = (N, cfg['num_classes'], T,
                (H // cfg['stride']) * 4 * 8, (W // cfg['stride']) * 4 * 8)
    assert out.shape == expected, (out.shape, expected)
    assert bool(jnp.all(jnp.isfinite(out)))
    print("KERNEL_OK")
</pallas_src>

<mosaic_0001>
module attributes {stable_mosaic.version = 11 : i64} {
  func.func @_fused_bn_block_kernel(%arg0: i32, %arg1: memref<600x96xf32, #tpu.memory_space<vmem>>, %arg2: memref<96x128xf32, #tpu.memory_space<vmem>>, %arg3: memref<1x128xf32, #tpu.memory_space<vmem>>, %arg4: memref<1x128xf32, #tpu.memory_space<vmem>>, %arg5: memref<600x128xf32, #tpu.memory_space<vmem>>) attributes {dimension_semantics = [#tpu.dimension_semantics<arbitrary>], iteration_bounds = array<i64: 1>, scalar_prefetch = 0 : i64, scratch_operands = 0 : i64, tpu.core_type = #tpu.core_type<tc>, window_params = [{pipeline_mode = #tpu.pipeline_mode<synchronous>, transform_indices = @transform_0, window_bounds = array<i64: 600, 96>}, {pipeline_mode = #tpu.pipeline_mode<synchronous>, transform_indices = @transform_1, window_bounds = array<i64: 96, 128>}, {pipeline_mode = #tpu.pipeline_mode<synchronous>, transform_indices = @transform_2, window_bounds = array<i64: 1, 128>}, {pipeline_mode = #tpu.pipeline_mode<synchronous>, transform_indices = @transform_3, window_bounds = array<i64: 1, 128>}, {pipeline_mode = #tpu.pipeline_mode<synchronous>, transform_indices = @transform_4, window_bounds = array<i64: 600, 128>}]} {
    %c0 = arith.constant 0 : index
    %c0_0 = arith.constant 0 : index
    %0 = vector.load %arg1[%c0, %c0_0] : memref<600x96xf32, #tpu.memory_space<vmem>>, vector<600x96xf32>
    %1 = arith.truncf %0 : vector<600x96xf32> to vector<600x96xbf16>
    %c0_1 = arith.constant 0 : index
    %c0_2 = arith.constant 0 : index
    %2 = vector.load %arg2[%c0_1, %c0_2] : memref<96x128xf32, #tpu.memory_space<vmem>>, vector<96x128xf32>
    %3 = arith.truncf %2 : vector<96x128xf32> to vector<96x128xbf16>
    %cst = arith.constant dense<0.000000e+00> : vector<600x128xf32>
    %4 = tpu.matmul %1, %3, %cst {dimension_numbers = #tpu.dot_dimension_numbers<[1], [0], [0], [1], [0, 0, 1, 1], [], []>} : vector<600x96xbf16>, vector<96x128xbf16>, vector<600x128xf32> -> vector<600x128xf32>
    %cst_3 = arith.constant dense<0.000000e+00> : vector<128xf32>
    %5 = vector.multi_reduction <add>, %4, %cst_3 [0] : vector<600x128xf32> to vector<128xf32>
    %6 = vector.shape_cast %5 : vector<128xf32> to vector<1x128xf32>
    %cst_4 = arith.constant 0.00166666671 : f32
    %7 = vector.broadcast %cst_4 : f32 to vector<1x128xf32>
    %8 = arith.mulf %6, %7 : vector<1x128xf32>
    %9 = arith.mulf %4, %4 : vector<600x128xf32>
    %cst_5 = arith.constant dense<0.000000e+00> : vector<128xf32>
    %10 = vector.multi_reduction <add>, %9, %cst_5 [0] : vector<600x128xf32> to vector<128xf32>
    %11 = vector.shape_cast %10 : vector<128xf32> to vector<1x128xf32>
    %cst_6 = arith.constant 0.00166666671 : f32
    %12 = vector.broadcast %cst_6 : f32 to vector<1x128xf32>
    %13 = arith.mulf %11, %12 : vector<1x128xf32>
    %14 = arith.mulf %8, %8 : vector<1x128xf32>
    %15 = arith.subf %13, %14 : vector<1x128xf32>
    %cst_7 = arith.constant 0.000000e+00 : f32
    %16 = vector.broadcast %cst_7 : f32 to vector<1x128xf32>
    %17 = arith.maximumf %15, %16 : vector<1x128xf32>
    %c0_8 = arith.constant 0 : index
    %c0_9 = arith.constant 0 : index
    %18 = vector.load %arg3[%c0_8, %c0_9] : memref<1x128xf32, #tpu.memory_space<vmem>>, vector<1x128xf32>
    %cst_10 = arith.constant 9.99999974E-6 : f32
    %19 = vector.broadcast %cst_10 : f32 to vector<1x128xf32>
    %20 = arith.addf %17, %19 : vector<1x128xf32>
    %21 = math.rsqrt %20 : vector<1x128xf32>
    %22 = arith.mulf %18, %21 : vector<1x128xf32>
    %c0_11 = arith.constant 0 : index
    %c0_12 = arith.constant 0 : index
    %23 = vector.load %arg4[%c0_11, %c0_12] : memref<1x128xf32, #tpu.memory_space<vmem>>, vector<1x128xf32>
    %24 = arith.mulf %8, %22 : vector<1x128xf32>
    %25 = arith.subf %23, %24 : vector<1x128xf32>
    %26 = vector.broadcast %22 : vector<1x128xf32> to vector<600x128xf32>
    %27 = arith.mulf %4, %26 : vector<600x128xf32>
    %28 = vector.broadcast %25 : vector<1x128xf32> to vector<600x128xf32>
    %29 = arith.addf %27, %28 : vector<600x128xf32>
    %cst_13 = arith.constant 0.000000e+00 : f32
    %30 = vector.broadcast %cst_13 : f32 to vector<600x128xf32>
    %31 = arith.cmpf ogt, %29, %30 : vector<600x128xf32>
    %cst_14 = arith.constant 0.00999999977 : f32
    %32 = vector.broadcast %cst_14 : f32 to vector<600x128xf32>
    %33 = arith.mulf %32, %29 : vector<600x128xf32>
    %34 = arith.select %31, %29, %33 : vector<600x128xi1>, vector<600x128xf32>
    %c0_15 = arith.constant 0 : index
    %c0_16 = arith.constant 0 : index
    %35 = vector.load %arg5[%c0_15, %c0_16] : memref<600x128xf32, #tpu.memory_space<vmem>>, vector<600x128xf32>
    tpu.vector_store %arg5[%c0_15, %c0_16], %34 {strides = array<i32>} : memref<600x128xf32, #tpu.memory_space<vmem>>, vector<600x128xf32>,
    return
  }
  func.func @transform_0(%arg0: i32) -> (i32, i32) {
    %c0_i32 = arith.constant 0 : i32
    %c0_i32_0 = arith.constant 0 : i32
    %c0_i32_1 = arith.constant 0 : i32
    return %c0_i32, %c0_i32_0 : i32, i32
  }
  func.func @transform_1(%arg0: i32) -> (i32, i32) {
    %c0_i32 = arith.constant 0 : i32
    %c0_i32_0 = arith.constant 0 : i32
    %c0_i32_1 = arith.constant 0 : i32
    return %c0_i32, %c0_i32_0 : i32, i32
  }
  func.func @transform_2(%arg0: i32) -> (i32, i32) {
    %c0_i32 = arith.constant 0 : i32
    %c0_i32_0 = arith.constant 0 : i32
    %c0_i32_1 = arith.constant 0 : i32
    return %c0_i32, %c0_i32_0 : i32, i32
  }
  func.func @transform_3(%arg0: i32) -> (i32, i32) {
    %c0_i32 = arith.constant 0 : i32
    %c0_i32_0 = arith.constant 0 : i32
    %c0_i32_1 = arith.constant 0 : i32
    return %c0_i32, %c0_i32_0 : i32, i32
  }
  func.func @transform_4(%arg0: i32) -> (i32, i32) {
    %c0_i32 = arith.constant 0 : i32
    %c0_i32_0 = arith.constant 0 : i32
    %c0_i32_1 = arith.constant 0 : i32
    return %c0_i32, %c0_i32_0 : i32, i32
  }
}

</mosaic_0001>

<bundles_post_ra>
// kernel: tpu_custom_call.1
= control target key start
LH: loop header
LB: loop body
LE: loop exit
PB: predicated region body
PF: predicated region fallthrough
CT: control target
= control target key end

     0   :  { %vm150_vm0 = vcmask 785408   ;;  %s3419_s0 = inlined_call_operand.vmem [shape: f32[600,96], index: 0, kind: input, shape index: {}]   ;;  %s3420_s1 = inlined_call_operand.vmem [shape: f32[96,128], index: 1, kind: input, shape index: {}]   ;;  %s3421_s2 = inlined_call_operand.vmem [shape: f32[1,128], index: 2, kind: input, shape index: {}]   ;;  %s3422_s3 = inlined_call_operand.vmem [shape: f32[1,128], index: 3, kind: input, shape index: {}]   ;;  %s3423_s4 = inlined_call_operand.hbm [shape: f32[600,128], index: 4, kind: output, shape index: {}]  }
   0x1   :  { %v132_v0 = vld [vmem:[%s3420_s1] sm:$0xff]  ;;  %v133_v1 = vld [vmem:[%s3420_s1 + $0x8] sm:$0xff]  ;;  %v134_v2 = vld [vmem:[%s3420_s1 + $0x10] sm:$0xff] }
   0x2   :  { %v144_v3 = vpack.c.bf16 %v133_v1, %v132_v0  ;;  %v135_v4 = vld [vmem:[%s3420_s1 + $0x18] sm:$0xff]  ;;  %v136_v6 = vld [vmem:[%s3420_s1 + $0x20] sm:$0xff]  ;;  %v137_v7 = vld [vmem:[%s3420_s1 + $0x28] sm:$0xff] }
   0x3   :  { %v145_v5 = vpack.c.bf16 %v135_v4, %v134_v2  ;;  %v19_v8 = vld [vmem:[%s3419_s0] sm:$0xff]  ;;  %v20_v9 = vld [vmem:[%s3419_s0 + $0x8] sm:$0xff]  ;;  %v146_v10 = vpack.c.bf16 %v137_v7, %v136_v6  ;;  %v138_v12 = vld [vmem:[%s3420_s1 + $0x30] sm:$0xff] }
   0x4   :  { %1408 = vmatprep.subr.bf16.mxu0 %v144_v3  ;;  %1496 = vmatprep.subr.bf16.mxu1 %v144_v3  ;;  %v94_v11 = vpack.c.bf16 %v20_v9, %v19_v8  ;;  %v139_v13 = vld [vmem:[%s3420_s1 + $0x38] sm:$0xff]  ;;  %v140_v15 = vld [vmem:[%s3420_s1 + $0x40] sm:$0xff]  ;;  %v141_v16 = vld [vmem:[%s3420_s1 + $0x48] sm:$0xff] }
   0x5   :  { %1409 = vmatpush3.bf16.msra.mxu0 %v144_v3  ;;  %1502 = vmatpush3.bf16.msra.mxu1 %v144_v3  ;;  %v147_v14 = vpack.c.bf16 %v139_v13, %v138_v12  ;;  %v148_v17 = vpack.c.bf16 %v141_v16, %v140_v15  ;;  %v142_v18 = vld [vmem:[%s3420_s1 + $0x50] sm:$0xff]  ;;  %v143_v19 = vld [vmem:[%s3420_s1 + $0x58] sm:$0xff]  ;;  %v59_v21 = vld [vmem:[%s3419_s0 + $0x140] sm:$0xff] }
   0x6   :  { %1410 = vmatprep.subr.bf16.mxu0 %v145_v5  ;;  %1497 = vmatprep.subr.bf16.mxu1 %v145_v5  ;;  %v149_v20 = vpack.c.bf16 %v143_v19, %v142_v18  ;;  %v60_v22 = vld [vmem:[%s3419_s0 + $0x148] sm:$0xff]  ;;  %v21_v24 = vld [vmem:[%s3419_s0 + $0x10] sm:$0xff]  ;;  %v22_v25 = vld [vmem:[%s3419_s0 + $0x18] sm:$0xff] }
   0x7   :  { %1420 = vmatprep.mubr.msk.bf16.mxu0 %vm150_vm0, %v94_v11  ;;  %v114_v23 = vpack.c.bf16 %v60_v22, %v59_v21  ;;  %v23_v26 = vld [vmem:[%s3419_s0 + $0x20] sm:$0xff]  ;;  %v61_v27 = vld [vmem:[%s3419_s0 + $0x150] sm:$0xff]  ;;  %v62_v28 = vld [vmem:[%s3419_s0 + $0x158] sm:$0xff]  ;;  %v95_v32 = vpack.c.bf16 %v22_v25, %v21_v24 }
   0x8   :  { %v24_v29 = vld [vmem:[%s3419_s0 + $0x28] sm:$0xff]  ;;  %v63_v30 = vld [vmem:[%s3419_s0 + $0x160] sm:$0xff]  ;;  %v115_v33 = vpack.c.bf16 %v62_v28, %v61_v27  ;;  %v25_v36 = vld [vmem:[%s3419_s0 + $0x30] sm:$0xff] }
   0x9   :  { %1411 = vmatpush3.bf16.msra.mxu0 %v145_v5  ;;  %1503 = vmatpush3.bf16.msra.mxu1 %v145_v5  ;;  %v64_v31 = vld [vmem:[%s3419_s0 + $0x168] sm:$0xff]  ;;  %v96_v34 = vpack.c.bf16 %v24_v29, %v23_v26  ;;  %v26_v37 = vld [vmem:[%s3419_s0 + $0x38] sm:$0xff]  ;;  %v27_v38 = vld [vmem:[%s3419_s0 + $0x40] sm:$0xff] }
   0xa   :  { %1412 = vmatprep.subr.bf16.mxu0 %v146_v10  ;;  %1498 = vmatprep.subr.bf16.mxu1 %v146_v10  ;;  %v116_v35 = vpack.c.bf16 %v64_v31, %v63_v30  ;;  %v28_v39 = vld [vmem:[%s3419_s0 + $0x48] sm:$0xff]  ;;  %v65_v40 = vld [vmem:[%s3419_s0 + $0x170] sm:$0xff]  ;;  %v66_v41 = vld [vmem:[%s3419_s0 + $0x178] sm:$0xff] }
   0xb   :  { %1460 = vmatprep.mubr.msk.bf16.mxu1 %vm150_vm0, %v114_v23  ;;  %v67_v42 = vld [vmem:[%s3419_s0 + $0x180] sm:$0xff]  ;;  %v68_v43 = vld [vmem:[%s3419_s0 + $0x188] sm:$0xff] }
   0xd   :  { %1413 = vmatpush3.bf16.msra.mxu0 %v146_v10  ;;  %1504 = vmatpush3.bf16.msra.mxu1 %v146_v10 }
   0xe   :  { %1414 = vmatprep.subr.bf16.mxu0 %v147_v14  ;;  %1499 = vmatprep.subr.bf16.mxu1 %v147_v14 }
  0x11   :  { %1415 = vmatpush3.bf16.msra.mxu0 %v147_v14  ;;  %1505 = vmatpush3.bf16.msra.mxu1 %v147_v14 }
  0x12   :  { %1416 = vmatprep.subr.bf16.mxu0 %v148_v17  ;;  %1500 = vmatprep.subr.bf16.mxu1 %v148_v17 }
  0x15   :  { %1417 = vmatpush3.bf16.msra.mxu0 %v148_v17  ;;  %1506 = vmatpush3.bf16.msra.mxu1 %v148_v17 }
  0x16   :  { %1418 = vmatprep.subr.bf16.mxu0 %v149_v20  ;;  %1501 = vmatprep.subr.bf16.mxu1 %v149_v20 }
  0x19   :  { %1419 = vmatpush3.bf16.msra.mxu0 %v149_v20  ;;  %1507 = vmatpush3.bf16.msra.mxu1 %v149_v20 }
  0x1c   :  { %1421 = vmatmul.mubr.msk.bf16.vlgmr.msra.gmra.mrb[0].mxu0 %vm150_vm0, %v95_v32  ;;  %1461 = vmatmul.mubr.msk.bf16.vlgmr.msra.gmra.mrb[0].mxu1 %vm150_vm0, %v115_v33 }
  0x1d   :  { %1424 = vmatprep.mubr.msk.bf16.mxu0 %vm150_vm0, %v96_v34  ;;  %1464 = vmatprep.mubr.msk.bf16.mxu1 %vm150_vm0, %v116_v35 }
  0x1e   :  { %9 = vsyncpa [#allocation3], 0  ;;  %v97_v44 = vpack.c.bf16 %v26_v37, %v25_v36  ;;  %v117_v45 = vpack.c.bf16 %v66_v41, %v65_v40  ;;  %v98_v46 = vpack.c.bf16 %v28_v39, %v27_v38  ;;  %v118_v47 = vpack.c.bf16 %v68_v43, %v67_v42  ;;  %v29_v48 = vld [vmem:[%s3419_s0 + $0x50] sm:$0xff]  ;;  %v30_v49 = vld [vmem:[%s3419_s0 + $0x58] sm:$0xff] }
  0x1f   :  { %v31_v50 = vld [vmem:[%s3419_s0 + $0x60] sm:$0xff]  ;;  %v69_v51 = vld [vmem:[%s3419_s0 + $0x190] sm:$0xff]  ;;  %v70_v52 = vld [vmem:[%s3419_s0 + $0x198] sm:$0xff]  ;;  %v99_v56 = vpack.c.bf16 %v30_v49, %v29_v48 }
  0x20   :  { %v32_v53 = vld [vmem:[%s3419_s0 + $0x68] sm:$0xff]  ;;  %v71_v54 = vld [vmem:[%s3419_s0 + $0x1a0] sm:$0xff]  ;;  %v119_v57 = vpack.c.bf16 %v70_v52, %v69_v51  ;;  %v33_v60 = vld [vmem:[%s3419_s0 + $0x70] sm:$0xff] }
  0x21   :  { %v72_v55 = vld [vmem:[%s3419_s0 + $0x1a8] sm:$0xff]  ;;  %v100_v58 = vpack.c.bf16 %v32_v53, %v31_v50  ;;  %v34_v61 = vld [vmem:[%s3419_s0 + $0x78] sm:$0xff]  ;;  %v35_v62 = vld [vmem:[%s3419_s0 + $0x80] sm:$0xff] }
  0x22   :  { %v120_v59 = vpack.c.bf16 %v72_v55, %v71_v54  ;;  %v73_v63 = vld [vmem:[%s3419_s0 + $0x1b0] sm:$0xff]  ;;  %v74_v0 = vld [vmem:[%s3419_s0 + $0x1b8] sm:$0xff]  ;;  %v36_v1 = vld [vmem:[%s3419_s0 + $0x88] sm:$0xff]  ;;  %v101_v4 = vpack.c.bf16 %v34_v61, %v33_v60 }
  0x23   :  { %v75_v2 = vld [vmem:[%s3419_s0 + $0x1c0] sm:$0xff]  ;;  %v76_v3 = vld [vmem:[%s3419_s0 + $0x1c8] sm:$0xff]  ;;  %v121_v5 = vpack.c.bf16 %v74_v0, %v73_v63  ;;  %v102_v6 = vpack.c.bf16 %v36_v1, %v35_v62  ;;  %v37_v8 = vld [vmem:[%s3419_s0 + $0x90] sm:$0xff] }
  0x24   :  { %1425 = vmatmul.mubr.msk.bf16.gmra.mrb[4].mxu0 %vm150_vm0, %v97_v44  ;;  %1465 = vmatmul.mubr.msk.bf16.gmra.mrb[4].mxu1 %vm150_vm0, %v117_v45  ;;  %v122_v7 = vpack.c.bf16 %v76_v3, %v75_v2  ;;  %v38_v9 = vld [vmem:[%s3419_s0 + $0x98] sm:$0xff]  ;;  %v39_v10 = vld [vmem:[%s3419_s0 + $0xa0] sm:$0xff]  ;;  %v77_v11 = vld [vmem:[%s3419_s0 + $0x1d0] sm:$0xff] }
  0x25   :  { %1428 = vmatprep.mubr.msk.bf16.mxu0 %vm150_vm0, %v98_v46  ;;  %1468 = vmatprep.mubr.msk.bf16.mxu1 %vm150_vm0, %v118_v47  ;;  %v78_v12 = vld [vmem:[%s3419_s0 + $0x1d8] sm:$0xff]  ;;  %v40_v13 = vld [vmem:[%s3419_s0 + $0xa8] sm:$0xff]  ;;  %v79_v14 = vld [vmem:[%s3419_s0 + $0x1e0] sm:$0xff]  ;;  %v103_v16 = vpack.c.bf16 %v38_v9, %v37_v8 }
  0x26   :  { %v80_v15 = vld [vmem:[%s3419_s0 + $0x1e8] sm:$0xff]  ;;  %v123_v17 = vpack.c.bf16 %v78_v12, %v77_v11  ;;  %v104_v18 = vpack.c.bf16 %v40_v13, %v39_v10  ;;  %v41_v20 = vld [vmem:[%s3419_s0 + $0xb0] sm:$0xff]  ;;  %v42_v21 = vld [vmem:[%s3419_s0 + $0xb8] sm:$0xff] }
  0x27   :  { %v124_v19 = vpack.c.bf16 %v80_v15, %v79_v14  ;;  %v43_v22 = vld [vmem:[%s3419_s0 + $0xc0] sm:$0xff]  ;;  %v81_v23 = vld [vmem:[%s3419_s0 + $0x1f0] sm:$0xff]  ;;  %v82_v24 = vld [vmem:[%s3419_s0 + $0x1f8] sm:$0xff]  ;;  %v105_v28 = vpack.c.bf16 %v42_v21, %v41_v20 }
  0x28   :  { %v44_v25 = vld [vmem:[%s3419_s0 + $0xc8] sm:$0xff]  ;;  %v83_v26 = vld [vmem:[%s3419_s0 + $0x200] sm:$0xff]  ;;  %v125_v29 = vpack.c.bf16 %v82_v24, %v81_v23  ;;  %v45_v32 = vld [vmem:[%s3419_s0 + $0xd0] sm:$0xff] }
  0x29   :  { %v84_v27 = vld [vmem:[%s3419_s0 + $0x208] sm:$0xff]  ;;  %v106_v30 = vpack.c.bf16 %v44_v25, %v43_v22  ;;  %v46_v33 = vld [vmem:[%s3419_s0 + $0xd8] sm:$0xff]  ;;  %v47_v34 = vld [vmem:[%s3419_s0 + $0xe0] sm:$0xff] }
  0x2a   :  { %v126_v31 = vpack.c.bf16 %v84_v27, %v83_v26  ;;  %v85_v35 = vld [vmem:[%s3419_s0 + $0x210] sm:$0xff]  ;;  %v86_v36 = vld [vmem:[%s3419_s0 + $0x218] sm:$0xff]  ;;  %v48_v37 = vld [vmem:[%s3419_s0 + $0xe8] sm:$0xff]  ;;  %v107_v40 = vpack.c.bf16 %v46_v33, %v45_v32 }
  0x2b   :  { %v87_v38 = vld [vmem:[%s3419_s0 + $0x220] sm:$0xff]  ;;  %v88_v39 = vld [vmem:[%s3419_s0 + $0x228] sm:$0xff]  ;;  %v127_v41 = vpack.c.bf16 %v86_v36, %v85_v35  ;;  %v108_v42 = vpack.c.bf16 %v48_v37, %v47_v34  ;;  %v49_v44 = vld [vmem:[%s3419_s0 + $0xf0] sm:$0xff] }
  0x2c   :  { %1429 = vmatmul.mubr.msk.bf16.gmra.mrb[8].mxu0 %vm150_vm0, %v99_v56  ;;  %1469 = vmatmul.mubr.msk.bf16.gmra.mrb[8].mxu1 %vm150_vm0, %v119_v57  ;;  %v128_v43 = vpack.c.bf16 %v88_v39, %v87_v38  ;;  %v50_v45 = vld [vmem:[%s3419_s0 + $0xf8] sm:$0xff]  ;;  %v51_v46 = vld [vmem:[%s3419_s0 + $0x100] sm:$0xff]  ;;  %v89_v47 = vld [vmem:[%s3419_s0 + $0x230] sm:$0xff] }
  0x2d   :  { %1432 = vmatprep.mubr.msk.bf16.mxu0 %vm150_vm0, %v100_v58  ;;  %1472 = vmatprep.mubr.msk.bf16.mxu1 %vm150_vm0, %v120_v59  ;;  %v90_v48 = vld [vmem:[%s3419_s0 + $0x238] sm:$0xff]  ;;  %v52_v49 = vld [vmem:[%s3419_s0 + $0x108] sm:$0xff]  ;;  %v91_v50 = vld [vmem:[%s3419_s0 + $0x240] sm:$0xff]  ;;  %v109_v52 = vpack.c.bf16 %v50_v45, %v49_v44 }
  0x2e   :  { %v92_v51 = vld [vmem:[%s3419_s0 + $0x248] sm:$0xff]  ;;  %v129_v53 = vpack.c.bf16 %v90_v48, %v89_v47  ;;  %v110_v54 = vpack.c.bf16 %v52_v49, %v51_v46  ;;  %v53_v56 = vld [vmem:[%s3419_s0 + $0x110] sm:$0xff]  ;;  %v54_v57 = vld [vmem:[%s3419_s0 + $0x118] sm:$0xff] }
  0x2f   :  { %v130_v55 = vpack.c.bf16 %v92_v51, %v91_v50  ;;  %v93_v58 = vld [vmem:[%s3419_s0 + $0x250] sm:$0xff]  ;;  %v55_v59 = vld [vmem:[%s3419_s0 + $0x120] sm:$0xff]  ;;  %v56_v60 = vld [vmem:[%s3419_s0 + $0x128] sm:$0xff]  ;;  %v111_v61 = vpack.c.bf16 %v54_v57, %v53_v56 }
  0x30   :  { %v131_v62 = vpack.c.bf16 %v93_v58, %v93_v58  ;;  %v112_v63 = vpack.c.bf16 %v56_v60, %v55_v59  ;;  %v57_v0 = vld [vmem:[%s3419_s0 + $0x130] sm:$0xff]  ;;  %v58_v1 = vld [vmem:[%s3419_s0 + $0x138] sm:$0xff] }
  0x31   :  { %v113_v2 = vpack.c.bf16 %v58_v1, %v57_v0 }
  0x34   :  { %1433 = vmatmul.mubr.msk.bf16.gmra.mrb[12].mxu0 %vm150_vm0, %v101_v4  ;;  %1473 = vmatmul.mubr.msk.bf16.gmra.mrb[12].mxu1 %vm150_vm0, %v121_v5 }
  0x35   :  { %1436 = vmatprep.mubr.msk.bf16.mxu0 %vm150_vm0, %v102_v6  ;;  %1476 = vmatprep.mubr.msk.bf16.mxu1 %vm150_vm0, %v122_v7 }
  0x3c   :  { %1437 = vmatmul.mubr.msk.bf16.gmra.mrb[16].mxu0 %vm150_vm0, %v103_v16  ;;  %1477 = vmatmul.mubr.msk.bf16.gmra.mrb[16].mxu1 %vm150_vm0, %v123_v17 }
  0x3d   :  { %1440 = vmatprep.mubr.msk.bf16.mxu0 %vm150_vm0, %v104_v18  ;;  %1480 = vmatprep.mubr.msk.bf16.mxu1 %vm150_vm0, %v124_v19 }
  0x44   :  { %1441 = vmatmul.mubr.msk.bf16.gmra.mrb[20].mxu0 %vm150_vm0, %v105_v28  ;;  %1481 = vmatmul.mubr.msk.bf16.gmra.mrb[20].mxu1 %vm150_vm0, %v125_v29 }
  0x45   :  { %1444 = vmatprep.mubr.msk.bf16.mxu0 %vm150_vm0, %v106_v30  ;;  %1484 = vmatprep.mubr.msk.bf16.mxu1 %vm150_vm0, %v126_v31 }
  0x4c   :  { %1445 = vmatmul.mubr.msk.bf16.gmra.mrb[24].mxu0 %vm150_vm0, %v107_v40  ;;  %1485 = vmatmul.mubr.msk.bf16.gmra.mrb[24].mxu1 %vm150_vm0, %v127_v41 }
  0x4d   :  { %1448 = vmatprep.mubr.msk.bf16.mxu0 %vm150_vm0, %v108_v42  ;;  %1488 = vmatprep.mubr.msk.bf16.mxu1 %vm150_vm0, %v128_v43 }
  0x54   :  { %1449 = vmatmul.mubr.msk.bf16.gmra.mrb[28].mxu0 %vm150_vm0, %v109_v52  ;;  %1489 = vmatmul.mubr.msk.bf16.gmra.mrb[28].mxu1 %vm150_vm0, %v129_v53 }
  0x55   :  { %1452 = vmatprep.mubr.msk.bf16.mxu0 %vm150_vm0, %v110_v54  ;;  %1492 = vmatprep.mubr.msk.bf16.mxu1 %vm150_vm0, %v130_v55 }
  0x5c   :  { %1453 = vmatmul.mubr.msk.bf16.gmra.mrb[32].mxu0 %vm150_vm0, %v111_v61  ;;  %1493 = vmatmul.mubr.msk.bf16.gmra.mrb[32].mxu1 %vm150_vm0, %v131_v62 }
  0x5d   :  { %1456 = vmatprep.mubr.msk.bf16.mxu0 %vm150_vm0, %v112_v63 }
  0x64   :  { %1457 = vmatmul.mubr.msk.bf16.gmra.mrb[36].mxu0 %vm150_vm0, %v113_v2 }
  0xef   :  { %v1864_v3 = vpop.f32.mrb[0].mxu0  ;;  %v1866_v4 = vpop.f32.mrb[0].mxu1 }
  0xf0   :  { %v1868_v5 = vpop.f32.mrb[1].mxu0  ;;  %v1870_v6 = vpop.f32.mrb[1].mxu1  ;;  %v684_v14 = vmul.f32 %v1864_v3, %v1864_v3 }
  0xf1   :  { %v1872_v7 = vpop.f32.mrb[2].mxu0  ;;  %v1874_v8 = vpop.f32.mrb[2].mxu1  ;;  %v682_v11 = vmul.f32 %v1868_v5, %v1868_v5 }
  0xf2   :  { %v1876_v9 = vpop.f32.mrb[3].mxu0  ;;  %v1878_v10 = vpop.f32.mrb[3].mxu1  ;;  %v685_v17 = vmul.f32 %v1872_v7, %v1872_v7 }
  0xf3   :  { %v601_v12 = vadd.f32 %v1876_v9, %v1868_v5  ;;  %v683_v13 = vmul.f32 %v1876_v9, %v1876_v9 }
  0xf5   :  { %v602_v15 = vadd.f32 %v1864_v3, %v601_v12  ;;  %v757_v16 = vadd.f32 %v683_v13, %v682_v11 }
  0xf7   :  { %v758_v18 = vadd.f32 %v757_v16, %v684_v14  ;;  %v1891_v19 = vpop.f32.mrb[4].mxu0  ;;  %v603_v20 = vadd.f32 %v1872_v7, %v602_v15  ;;  %v1894_v21 = vpop.f32.mrb[4].mxu1 }
  0xf8   :  { %v1896_v22 = vpop.f32.mrb[5].mxu0  ;;  %v1898_v23 = vpop.f32.mrb[5].mxu1  ;;  %v688_v34 = vmul.f32 %v1891_v19, %v1891_v19 }
  0xf9   :  { %v604_v24 = vadd.f32 %v603_v20, %v1896_v22  ;;  %v686_v25 = vmul.f32 %v1896_v22, %v1896_v22  ;;  %v759_v26 = vadd.f32 %v758_v18, %v685_v17  ;;  %v1903_v27 = vpop.f32.mrb[6].mxu0  ;;  %v1905_v28 = vpop.f32.mrb[6].mxu1 }
  0xfa   :  { %v1907_v29 = vpop.f32.mrb[7].mxu0  ;;  %v1909_v30 = vpop.f32.mrb[7].mxu1  ;;  %v689_v37 = vmul.f32 %v1903_v27, %v1903_v27 }
  0xfb   :  { %v760_v31 = vadd.f32 %v759_v26, %v686_v25  ;;  %v605_v32 = vadd.f32 %v604_v24, %v1907_v29  ;;  %v687_v33 = vmul.f32 %v1907_v29, %v1907_v29 }
  0xfd   :  { %v606_v35 = vadd.f32 %v1891_v19, %v605_v32  ;;  %v761_v36 = vadd.f32 %v760_v31, %v687_v33 }
  0xff   :  { %v762_v38 = vadd.f32 %v761_v36, %v688_v34  ;;  %v1919_v39 = vpop.f32.mrb[8].mxu0  ;;  %v607_v40 = vadd.f32 %v1903_v27, %v606_v35  ;;  %v1922_v41 = vpop.f32.mrb[8].mxu1 }
 0x100   :  { %v1924_v42 = vpop.f32.mrb[9].mxu0  ;;  %v1926_v43 = vpop.f32.mrb[9].mxu1  ;;  %v692_v54 = vmul.f32 %v1919_v39, %v1919_v39 }
 0x101   :  { %v608_v44 = vadd.f32 %v607_v40, %v1924_v42  ;;  %v690_v45 = vmul.f32 %v1924_v42, %v1924_v42  ;;  %v763_v46 = vadd.f32 %v762_v38, %v689_v37  ;;  %v1931_v47 = vpop.f32.mrb[10].mxu0  ;;  %v1933_v48 = vpop.f32.mrb[10].mxu1 }
 0x102   :  { %v1935_v49 = vpop.f32.mrb[11].mxu0  ;;  %v1937_v50 = vpop.f32.mrb[11].mxu1  ;;  %v693_v57 = vmul.f32 %v1931_v47, %v1931_v47 }
 0x103   :  { %v764_v51 = vadd.f32 %v763_v46, %v690_v45  ;;  %v609_v52 = vadd.f32 %v608_v44, %v1935_v49  ;;  %v691_v53 = vmul.f32 %v1935_v49, %v1935_v49 }
 0x105   :  { %v610_v55 = vadd.f32 %v1919_v39, %v609_v52  ;;  %v765_v56 = vadd.f32 %v764_v51, %v691_v53 }
 0x107   :  { %v766_v58 = vadd.f32 %v765_v56, %v692_v54  ;;  %v1947_v59 = vpop.f32.mrb[12].mxu0  ;;  %v611_v60 = vadd.f32 %v1931_v47, %v610_v55  ;;  %v1950_v61 = vpop.f32.mrb[12].mxu1 }
 0x108   :  { %3504 = vst [vmem:[#allocation5_spill] sm:$0xff] %v1947_v59  ;;  %v1952_v62 = vpop.f32.mrb[13].mxu0  ;;  %v1954_v63 = vpop.f32.mrb[13].mxu1  ;;  %v696_v18 = vmul.f32 %v1947_v59, %v1947_v59 }
 0x109   :  { %3505 = vst [vmem:[#allocation6_spill] sm:$0xff] %v1952_v62  ;;  %v612_v0 = vadd.f32 %v611_v60, %v1952_v62  ;;  %v694_v1 = vmul.f32 %v1952_v62, %v1952_v62  ;;  %v767_v2 = vadd.f32 %v766_v58, %v693_v57  ;;  %v1959_v11 = vpop.f32.mrb[14].mxu0  ;;  %v1961_v12 = vpop.f32.mrb[14].mxu1 }
 0x10a   :  { %3506 = vst [vmem:[#allocation7_spill] sm:$0xff] %v1959_v11  ;;  %v1963_v13 = vpop.f32.mrb[15].mxu0  ;;  %v1965_v14 = vpop.f32.mrb[15].mxu1  ;;  %v697_v25 = vmul.f32 %v1959_v11, %v1959_v11 }
 0x10b   :  { %3507 = vst [vmem:[#allocation8_spill] sm:$0xff] %v1963_v13  ;;  %v768_v15 = vadd.f32 %v767_v2, %v694_v1  ;;  %v613_v16 = vadd.f32 %v612_v0, %v1963_v13  ;;  %v695_v17 = vmul.f32 %v1963_v13, %v1963_v13 }
 0x10d   :  { %v614_v20 = vadd.f32 %v1947_v59, %v613_v16  ;;  %v769_v24 = vadd.f32 %v768_v15, %v695_v17 }
 0x10f   :  { %v770_v26 = vadd.f32 %v769_v24, %v696_v18  ;;  %v1975_v31 = vpop.f32.mrb[16].mxu0  ;;  %v615_v32 = vadd.f32 %v1959_v11, %v614_v20  ;;  %v1978_v33 = vpop.f32.mrb[16].mxu1 }
 0x110   :  { %3508 = vst [vmem:[#allocation9_spill] sm:$0xff] %v1975_v31  ;;  %v1980_v34 = vpop.f32.mrb[17].mxu0  ;;  %v1982_v35 = vpop.f32.mrb[17].mxu1  ;;  %v700_v54 = vmul.f32 %v1975_v31, %v1975_v31 }
 0x111   :  { %3509 = vst [vmem:[#allocation10_spill] sm:$0xff] %v1980_v34  ;;  %v616_v36 = vadd.f32 %v615_v32, %v1980_v34  ;;  %v698_v37 = vmul.f32 %v1980_v34, %v1980_v34  ;;  %v771_v38 = vadd.f32 %v770_v26, %v697_v25  ;;  %v1987_v40 = vpop.f32.mrb[18].mxu0  ;;  %v1989_v44 = vpop.f32.mrb[18].mxu1 }
 0x112   :  { %3510 = vst [vmem:[#allocation11_spill] sm:$0xff] %v1987_v40  ;;  %v1991_v45 = vpop.f32.mrb[19].mxu0  ;;  %v1993_v46 = vpop.f32.mrb[19].mxu1  ;;  %v701_v57 = vmul.f32 %v1987_v40, %v1987_v40 }
 0x113   :  { %3511 = vst [vmem:[#allocation12_spill] sm:$0xff] %v1991_v45  ;;  %v772_v51 = vadd.f32 %v771_v38, %v698_v37  ;;  %v617_v52 = vadd.f32 %v616_v36, %v1991_v45  ;;  %v699_v53 = vmul.f32 %v1991_v45, %v1991_v45 }
 0x115   :  { %v618_v55 = vadd.f32 %v1975_v31, %v617_v52  ;;  %v773_v56 = vadd.f32 %v772_v51, %v699_v53 }
 0x117   :  { %v774_v58 = vadd.f32 %v773_v56, %v700_v54  ;;  %v2003_v60 = vpop.f32.mrb[20].mxu0  ;;  %v619_v0 = vadd.f32 %v1987_v40, %v618_v55  ;;  %v2006_v1 = vpop.f32.mrb[20].mxu1 }
 0x118   :  { %3512 = vst [vmem:[#allocation13_spill] sm:$0xff] %v2003_v60  ;;  %v2008_v2 = vpop.f32.mrb[21].mxu0  ;;  %v2010_v15 = vpop.f32.mrb[21].mxu1  ;;  %v704_v38 = vmul.f32 %v2003_v60, %v2003_v60 }
 0x119   :  { %3513 = vst [vmem:[#allocation14_spill] sm:$0xff] %v2008_v2  ;;  %v620_v16 = vadd.f32 %v619_v0, %v2008_v2  ;;  %v702_v17 = vmul.f32 %v2008_v2, %v2008_v2  ;;  %v775_v18 = vadd.f32 %v774_v58, %v701_v57  ;;  %v2015_v20 = vpop.f32.mrb[22].mxu0  ;;  %v2017_v24 = vpop.f32.mrb[22].mxu1 }
 0x11a   :  { %3514 = vst [vmem:[#allocation15_spill] sm:$0xff] %v2015_v20  ;;  %v2019_v25 = vpop.f32.mrb[23].mxu0  ;;  %v2021_v26 = vpop.f32.mrb[23].mxu1  ;;  %v705_v53 = vmul.f32 %v2015_v20, %v2015_v20 }
 0x11b   :  { %3515 = vst [vmem:[#allocation16_spill] sm:$0xff] %v2019_v25  ;;  %v776_v32 = vadd.f32 %v775_v18, %v702_v17  ;;  %v621_v36 = vadd.f32 %v620_v16, %v2019_v25  ;;  %v703_v37 = vmul.f32 %v2019_v25, %v2019_v25 }
 0x11d   :  { %v622_v51 = vadd.f32 %v2003_v60, %v621_v36  ;;  %v777_v52 = vadd.f32 %v776_v32, %v703_v37 }
 0x11f   :  { %v778_v54 = vadd.f32 %v777_v52, %v704_v38  ;;  %v2031_v55 = vpop.f32.mrb[24].mxu0  ;;  %v623_v56 = vadd.f32 %v2015_v20, %v622_v51  ;;  %v2034_v57 = vpop.f32.mrb[24].mxu1 }
 0x120   :  { %3516 = vst [vmem:[#allocation17_spill] sm:$0xff] %v2031_v55  ;;  %3517 = vst [vmem:[#allocation18_spill] sm:$0xff] %v2034_v57  ;;  %v2036_v58 = vpop.f32.mrb[25].mxu0  ;;  %v2038_v0 = vpop.f32.mrb[25].mxu1 }
 0x121   :  { %3518 = vst [vmem:[#allocation19_spill] sm:$0xff] %v2036_v58  ;;  %3519 = vst [vmem:[#allocation20_spill] sm:$0xff] %v2038_v0  ;;  %v624_v16 = vadd.f32 %v623_v56, %v2036_v58  ;;  %v706_v17 = vmul.f32 %v2036_v58, %v2036_v58  ;;  %v779_v18 = vadd.f32 %v778_v54, %v705_v53  ;;  %v2043_v32 = vpop.f32.mrb[26].mxu0  ;;  %v2045_v36 = vpop.f32.mrb[26].mxu1 }
 0x122   :  { %3520 = vst [vmem:[#allocation21_spill] sm:$0xff] %v2043_v32  ;;  %3521 = vst [vmem:[#allocation22_spill] sm:$0xff] %v2045_v36  ;;  %v2047_v37 = vpop.f32.mrb[27].mxu0  ;;  %v2049_v38 = vpop.f32.mrb[27].mxu1  ;;  %v708_v56 = vmul.f32 %v2031_v55, %v2031_v55  ;;  %v709_v54 = vmul.f32 %v2043_v32, %v2043_v32 }
 0x123   :  { %3522 = vst [vmem:[#allocation23_spill] sm:$0xff] %v2047_v37  ;;  %3523 = vst [vmem:[#allocation24_spill] sm:$0xff] %v2049_v38  ;;  %v780_v51 = vadd.f32 %v779_v18, %v706_v17  ;;  %v625_v52 = vadd.f32 %v624_v16, %v2047_v37  ;;  %v707_v20 = vmul.f32 %v2047_v37, %v2047_v37 }
 0x125   :  { %v626_v58 = vadd.f32 %v2031_v55, %v625_v52  ;;  %v781_v53 = vadd.f32 %v780_v51, %v707_v20 }
 0x127   :  { %v782_v60 = vadd.f32 %v781_v53, %v708_v56  ;;  %v2059_v25 = vpop.f32.mrb[28].mxu0  ;;  %v627_v2 = vadd.f32 %v2043_v32, %v626_v58  ;;  %v2062_v17 = vpop.f32.mrb[28].mxu1 }
 0x128   :  { %3524 = vst [vmem:[#allocation25_spill] sm:$0xff] %v2059_v25  ;;  %3525 = vst [vmem:[#allocation26_spill] sm:$0xff] %v2062_v17  ;;  %v2064_v16 = vpop.f32.mrb[29].mxu0  ;;  %v2066_v18 = vpop.f32.mrb[29].mxu1 }
 0x129   :  { %3526 = vst [vmem:[#allocation27_spill] sm:$0xff] %v2064_v16  ;;  %3527 = vst [vmem:[#allocation28_spill] sm:$0xff] %v2066_v18  ;;  %v628_v37 = vadd.f32 %v627_v2, %v2064_v16  ;;  %v710_v52 = vmul.f32 %v2064_v16, %v2064_v16  ;;  %v783_v20 = vadd.f32 %v782_v60, %v709_v54  ;;  %v2071_v51 = vpop.f32.mrb[30].mxu0  ;;  %v2073_v55 = vpop.f32.mrb[30].mxu1 }
 0x12a   :  { %3528 = vst [vmem:[#allocation29_spill] sm:$0xff] %v2071_v51  ;;  %3529 = vst [vmem:[#allocation30_spill] sm:$0xff] %v2073_v55  ;;  %v2075_v56 = vpop.f32.mrb[31].mxu0  ;;  %v2077_v53 = vpop.f32.mrb[31].mxu1  ;;  %v712_v2 = vmul.f32 %v2059_v25, %v2059_v25  ;;  %v713_v54 = vmul.f32 %v2071_v51, %v2071_v51 }
 0x12b   :  { %3530 = vst [vmem:[#allocation31_spill] sm:$0xff] %v2075_v56  ;;  %3531 = vst [vmem:[#allocation32_spill] sm:$0xff] %v2077_v53  ;;  %v784_v58 = vadd.f32 %v783_v20, %v710_v52  ;;  %v629_v32 = vadd.f32 %v628_v37, %v2075_v56  ;;  %v711_v40 = vmul.f32 %v2075_v56, %v2075_v56 }
 0x12d   :  { %v630_v16 = vadd.f32 %v2059_v25, %v629_v32  ;;  %v785_v60 = vadd.f32 %v784_v58, %v711_v40 }
 0x12f   :  { %v786_v31 = vadd.f32 %v785_v60, %v712_v2  ;;  %v2087_v45 = vpop.f32.mrb[32].mxu0  ;;  %v631_v34 = vadd.f32 %v2071_v51, %v630_v16  ;;  %v2090_v52 = vpop.f32.mrb[32].mxu1 }
 0x130   :  { %3532 = vst [vmem:[#allocation33_spill] sm:$0xff] %v2087_v45  ;;  %v2092_v37 = vpop.f32.mrb[33].mxu0  ;;  %v2094_v20 = vpop.f32.mrb[33].mxu1 }
 0x131   :  { %3533 = vst [vmem:[#allocation34_spill] sm:$0xff] %v2092_v37  ;;  %3534 = vst [vmem:[#allocation35_spill] sm:$0xff] %v2094_v20  ;;  %v632_v56 = vadd.f32 %v631_v34, %v2092_v37  ;;  %v714_v32 = vmul.f32 %v2092_v37, %v2092_v37  ;;  %v787_v40 = vadd.f32 %v786_v31, %v713_v54  ;;  %v2099_v58 = vpop.f32.mrb[34].mxu0  ;;  %v1495_v25 = vpop.f32.mrb[34].mxu1 }
 0x132   :  { %3535 = vst [vmem:[#allocation36_spill] sm:$0xff] %v2099_v58  ;;  %v2101_v2 = vpop.f32.mrb[35].mxu0  ;;  %v2103_v60 = vpop.f32.mrb[35].mxu1  ;;  %v716_v34 = vmul.f32 %v2087_v45, %v2087_v45  ;;  %v717_v31 = vmul.f32 %v2099_v58, %v2099_v58 }
 0x133   :  { %3536 = vst [vmem:[#allocation37_spill] sm:$0xff] %v2101_v2  ;;  %v788_v16 = vadd.f32 %v787_v40, %v714_v32  ;;  %v633_v51 = vadd.f32 %v632_v56, %v2101_v2  ;;  %v715_v11 = vmul.f32 %v2101_v2, %v2101_v2 }
 0x135   :  { %v634_v59 = vadd.f32 %v2087_v45, %v633_v51  ;;  %v789_v37 = vadd.f32 %v788_v16, %v715_v11  ;;  %v723_v45 = vmul.f32 %v1878_v10, %v1878_v10 }
 0x137   :  { %v790_v25 = vadd.f32 %v789_v37, %v716_v34  ;;  %v2113_v54 = vpop.f32.mrb[36].mxu0  ;;  %v635_v13 = vadd.f32 %v2099_v58, %v634_v59 }
 0x138   :  { %v2116_v32 = vpop.f32.mrb[37].mxu0  ;;  %v720_v59 = vmul.f32 %v2113_v54, %v2113_v54 }
 0x139   :  { %3537 = vst [vmem:[#allocation38_spill] sm:$0xff] %v2116_v32  ;;  %v636_v56 = vadd.f32 %v635_v13, %v2116_v32  ;;  %v718_v40 = vmul.f32 %v2116_v32, %v2116_v32  ;;  %v791_v2 = vadd.f32 %v790_v25, %v717_v31  ;;  %v2121_v62 = vpop.f32.mrb[38].mxu0 }
 0x13a   :  { %v2123_v51 = vpop.f32.mrb[39].mxu0  ;;  %v721_v32 = vmul.f32 %v2121_v62, %v2121_v62 }
 0x13b   :  { %3538 = vst [vmem:[#allocation39_spill] sm:$0xff] %v2123_v51  ;;  %v792_v11 = vadd.f32 %v791_v2, %v718_v40  ;;  %v637_v16 = vadd.f32 %v636_v56, %v2123_v51  ;;  %v719_v37 = vmul.f32 %v2123_v51, %v2123_v51  ;;  %v722_v2 = vmul.f32 %v1870_v6, %v1870_v6 }
 0x13d   :  { %v638_v34 = vadd.f32 %v2113_v54, %v637_v16  ;;  %v793_v13 = vadd.f32 %v792_v11, %v719_v37  ;;  %v724_v11 = vmul.f32 %v1866_v4, %v1866_v4 }
 0x13f   :  { %v794_v31 = vadd.f32 %v793_v13, %v720_v59  ;;  %v639_v25 = vadd.f32 %v2121_v62, %v638_v34  ;;  %v725_v59 = vmul.f32 %v1874_v8, %v1874_v8 }
 0x141   :  { %v640_v56 = vadd.f32 %v639_v25, %v1870_v6  ;;  %v795_v40 = vadd.f32 %v794_v31, %v721_v32  ;;  %v726_v32 = vmul.f32 %v1898_v23, %v1898_v23 }
 0x143   :  { %v796_v58 = vadd.f32 %v795_v40, %v722_v2  ;;  %v641_v51 = vadd.f32 %v640_v56, %v1878_v10  ;;  %v727_v40 = vmul.f32 %v1909_v30, %v1909_v30 }
 0x145   :  { %v642_v16 = vadd.f32 %v1866_v4, %v641_v51  ;;  %v797_v37 = vadd.f32 %v796_v58, %v723_v45  ;;  %v728_v45 = vmul.f32 %v1894_v21, %v1894_v21 }
 0x147   :  { %v798_v34 = vadd.f32 %v797_v37, %v724_v11  ;;  %v643_v13 = vadd.f32 %v1874_v8, %v642_v16  ;;  %v729_v11 = vmul.f32 %v1905_v28, %v1905_v28 }
 0x149   :  { %v644_v31 = vadd.f32 %v643_v13, %v1898_v23  ;;  %v799_v25 = vadd.f32 %v798_v34, %v725_v59  ;;  %v730_v59 = vmul.f32 %v1926_v43, %v1926_v43 }
 0x14b   :  { %v800_v2 = vadd.f32 %v799_v25, %v726_v32  ;;  %v645_v56 = vadd.f32 %v644_v31, %v1909_v30  ;;  %v731_v25 = vmul.f32 %v1937_v50, %v1937_v50 }
 0x14d   :  { %v646_v58 = vadd.f32 %v1894_v21, %v645_v56  ;;  %v801_v51 = vadd.f32 %v800_v2, %v727_v40  ;;  %v732_v2 = vmul.f32 %v1922_v41, %v1922_v41 }
 0x14f   :  { %v802_v16 = vadd.f32 %v801_v51, %v728_v45  ;;  %v647_v37 = vadd.f32 %v1905_v28, %v646_v58  ;;  %v733_v45 = vmul.f32 %v1933_v48, %v1933_v48 }
 0x151   :  { %v648_v34 = vadd.f32 %v647_v37, %v1926_v43  ;;  %v803_v13 = vadd.f32 %v802_v16, %v729_v11  ;;  %v734_v11 = vmul.f32 %v1954_v63, %v1954_v63 }
 0x153   :  { %v804_v32 = vadd.f32 %v803_v13, %v730_v59  ;;  %v649_v31 = vadd.f32 %v648_v34, %v1937_v50  ;;  %v735_v13 = vmul.f32 %v1965_v14, %v1965_v14 }
 0x155   :  { %v650_v56 = vadd.f32 %v1922_v41, %v649_v31  ;;  %v805_v40 = vadd.f32 %v804_v32, %v731_v25  ;;  %v736_v32 = vmul.f32 %v1950_v61, %v1950_v61 }
 0x157   :  { %v806_v58 = vadd.f32 %v805_v40, %v732_v2  ;;  %v651_v51 = vadd.f32 %v1933_v48, %v650_v56  ;;  %v737_v2 = vmul.f32 %v1961_v12, %v1961_v12 }
 0x159   :  { %v652_v16 = vadd.f32 %v651_v51, %v1954_v63  ;;  %v807_v37 = vadd.f32 %v806_v58, %v733_v45  ;;  %v738_v45 = vmul.f32 %v1982_v35, %v1982_v35 }
 0x15b   :  { %v808_v59 = vadd.f32 %v807_v37, %v734_v11  ;;  %v653_v34 = vadd.f32 %v652_v16, %v1965_v14  ;;  %v739_v37 = vmul.f32 %v1993_v46, %v1993_v46 }
 0x15d   :  { %v654_v31 = vadd.f32 %v1950_v61, %v653_v34  ;;  %v809_v25 = vadd.f32 %v808_v59, %v735_v13  ;;  %v740_v59 = vmul.f32 %v1978_v33, %v1978_v33 }
 0x15f   :  { %v810_v56 = vadd.f32 %v809_v25, %v736_v32  ;;  %v655_v40 = vadd.f32 %v1961_v12, %v654_v31  ;;  %v741_v32 = vmul.f32 %v1989_v44, %v1989_v44 }
 0x161   :  { %v656_v58 = vadd.f32 %v655_v40, %v1982_v35  ;;  %v811_v51 = vadd.f32 %v810_v56, %v737_v2  ;;  %v742_v2 = vmul.f32 %v2010_v15, %v2010_v15 }
 0x163   :  { %v812_v11 = vadd.f32 %v811_v51, %v738_v45  ;;  %v657_v16 = vadd.f32 %v656_v58, %v1993_v46  ;;  %v743_v51 = vmul.f32 %v2021_v26, %v2021_v26 }
 0x165   :  { %v658_v34 = vadd.f32 %v1978_v33, %v657_v16  ;;  %v813_v13 = vadd.f32 %v812_v11, %v739_v37  ;;  %v744_v11 = vmul.f32 %v2006_v1, %v2006_v1 }
 0x167   :  { %v814_v31 = vadd.f32 %v813_v13, %v740_v59  ;;  %v659_v25 = vadd.f32 %v1989_v44, %v658_v34  ;;  %v745_v59 = vmul.f32 %v2017_v24, %v2017_v24 }
 0x169   :  { %v660_v56 = vadd.f32 %v659_v25, %v2010_v15  ;;  %v815_v40 = vadd.f32 %v814_v31, %v741_v32  ;;  %v746_v32 = vmul.f32 %v2038_v0, %v2038_v0 }
 0x16b   :  { %v816_v45 = vadd.f32 %v815_v40, %v742_v2  ;;  %v661_v58 = vadd.f32 %v660_v56, %v2021_v26  ;;  %v747_v40 = vmul.f32 %v2049_v38, %v2049_v38 }
 0x16d   :  { %v662_v16 = vadd.f32 %v2006_v1, %v661_v58  ;;  %v817_v37 = vadd.f32 %v816_v45, %v743_v51  ;;  %v748_v45 = vmul.f32 %v2034_v57, %v2034_v57 }
 0x16f   :  { %v818_v34 = vadd.f32 %v817_v37, %v744_v11  ;;  %v663_v13 = vadd.f32 %v2017_v24, %v662_v16  ;;  %v749_v11 = vmul.f32 %v2045_v36, %v2045_v36 }
 0x171   :  { %v664_v31 = vadd.f32 %v663_v13, %v2038_v0  ;;  %v819_v25 = vadd.f32 %v818_v34, %v745_v59  ;;  %v750_v59 = vmul.f32 %v2066_v18, %v2066_v18 }
 0x173   :  { %v820_v2 = vadd.f32 %v819_v25, %v746_v32  ;;  %v665_v56 = vadd.f32 %v664_v31, %v2049_v38  ;;  %v751_v25 = vmul.f32 %v2077_v53, %v2077_v53 }
 0x175   :  { %v666_v58 = vadd.f32 %v2034_v57, %v665_v56  ;;  %v821_v51 = vadd.f32 %v820_v2, %v747_v40  ;;  %v752_v2 = vmul.f32 %v2062_v17, %v2062_v17 }
 0x177   :  { %v822_v16 = vadd.f32 %v821_v51, %v748_v45  ;;  %v667_v37 = vadd.f32 %v2045_v36, %v666_v58  ;;  %v753_v45 = vmul.f32 %v2073_v55, %v2073_v55 }
 0x179   :  { %v668_v34 = vadd.f32 %v667_v37, %v2066_v18  ;;  %v823_v13 = vadd.f32 %v822_v16, %v749_v11  ;;  %v754_v11 = vmul.f32 %v2094_v20, %v2094_v20 }
 0x17b   :  { %v824_v32 = vadd.f32 %v823_v13, %v750_v59  ;;  %v669_v31 = vadd.f32 %v668_v34, %v2077_v53  ;;  %v755_v13 = vmul.f32 %v2103_v60, %v2103_v60 }
 0x17d   :  { %v670_v56 = vadd.f32 %v2062_v17, %v669_v31  ;;  %v825_v40 = vadd.f32 %v824_v32, %v751_v25  ;;  %v756_v32 = vmul.f32 %v2090_v52, %v2090_v52 }
 0x17f   :  { %v826_v58 = vadd.f32 %v825_v40, %v752_v2  ;;  %v671_v51 = vadd.f32 %v2073_v55, %v670_v56 }
 0x181   :  { %v672_v16 = vadd.f32 %v671_v51, %v2094_v20  ;;  %v827_v37 = vadd.f32 %v826_v58, %v753_v45 }
 0x183   :  { %v828_v59 = vadd.f32 %v827_v37, %v754_v11  ;;  %v673_v34 = vadd.f32 %v672_v16, %v2103_v60 }
 0x185   :  { %v674_v31 = vadd.f32 %v2090_v52, %v673_v34  ;;  %v829_v25 = vadd.f32 %v828_v59, %v755_v13  ;;  %v849_v59 = vlaneseq }
 0x187   :  { %v675_v2 = vrot.slane %v674_v31, 4  ;;  %v830_v56 = vadd.f32 %v829_v25, %v756_v32  ;;  %v850_v13 = vshrl.u32 %v849_v59, 7  ;;  %v3545_v59 = vld [vmem:[#allocation9_spill] sm:$0xff] }
 0x189   :  { %v676_v40 = vadd.f32 %v675_v2, %v674_v31  ;;  %v831_v55 = vrot.slane %v830_v56, 4 }
 0x18b   :  { %v677_v17 = vrot.slane %v676_v40, 2  ;;  %v832_v53 = vadd.f32 %v831_v55, %v830_v56  ;;  %v841_v55 = vld [vmem:[%s3421_s2] sm:$0x1]  ;;  %s1537_s2 = smov [#allocation2]  }
 0x18d   :  { %v678_v51 = vadd.f32 %v677_v17, %v676_v40  ;;  %v833_v45 = vrot.slane %v832_v53, 2  ;;  %v851_v17 = vsub.s32 0, %v850_v13  ;;  %v3539_v40 = vld [vmem:[#allocation6_spill] sm:$0xff] }
 0x18f   :  { %v679_v58 = vrot.slane %v678_v51, 1  ;;  %v834_v11 = vadd.f32 %v833_v45, %v832_v53  ;;  %v845_v53 = vld [vmem:[%s3422_s3] sm:$0x1]  ;;  %s1315_s3 = sshll.u32 %s1537_s2, 4  ;;  %s3372_s3 = int_to_ptr.vmem [resolvable:$true] %s1315_s3 }
 0x190   :  { %s1513_s30 = scalar_lea.vmem %s3372_s3, 9600  ;;  %p1518_p1 = scmp.lt.s32.totalorder %s3372_s3, %s3372_s3 }
 0x191   :  { %v680_v16 = vadd.f32 %v679_v58, %v678_v51  ;;  %v835_v37 = vrot.slane %v834_v11, 1  ;;  %p1514_p0 = scmp.ne.s32.totalorder %s3372_s3, %s1513_s30  ;;  %p1519_p2 = scmp.lt.s32.totalorder %s1513_s30, %s1513_s30 }
 0x193   :  { %v681_v20 = vmul.f32 0.0016666667, %v680_v16  ;;  %v836_v18 = vadd.f32 %v835_v37, %v834_v11  ;;  %v3544_v37 = vld [vmem:[#allocation12_spill] sm:$0xff]  ;;  %p1520_p3 = por %p1519_p2, %p1518_p1 }
 0x195   :  { %v837_v36 = vmul.f32 0.0016666667, %v836_v18  ;;  %v838_v57 = vmul.f32 %v681_v20, %v681_v20  ;;  %p1521_p4 = pnand %p1520_p3, %p1514_p0 }
 0x197   :  { %v839_v38 = vsub.f32 %v837_v36, %v838_v57 }
 0x199   :  { %v840_v0 = vmax.f32 %v839_v38, 0.0 }
 0x19b   :  { %v842_v34 = vadd.f32 1e-05, %v840_v0 }
 0x19d   :  { %1511 = vrsqrt.f32 %v842_v34 }
 0x1a7   :  { %v1512_v32 = vpop.eup %1511 }
 0x1a8   :  { %v844_v31 = vmul.f32 %v1512_v32, %v841_v55  ;;  %v3546_v55 = vld [vmem:[#allocation11_spill] sm:$0xff] }
 0x1aa   :  { %v846_v25 = vmul.f32 %v844_v31, %v681_v20  ;;  %v2245_v18 = vrot.slane %v844_v31, %v851_v17  ;;  %v3547_v31 = vld [vmem:[#allocation14_spill] sm:$0xff] }
 0x1ac   :  { %v847_v57 = vsub.f32 %v845_v53, %v846_v25  ;;  %v927_v0 = vmul.f32 %v2245_v18, %v2103_v60  ;;  %v2251_v36 = vmul.f32 %v2245_v18, %v1868_v5  ;;  %v2255_v38 = vmul.f32 %v2245_v18, %v1876_v9  ;;  %v3548_v25 = vld [vmem:[#allocation16_spill] sm:$0xff] }
 0x1ad   :  { %v2259_v2 = vmul.f32 %v1864_v3, %v2245_v18  ;;  %v2263_v20 = vmul.f32 %v1872_v7, %v2245_v18  ;;  %v2267_v56 = vmul.f32 %v2245_v18, %v1896_v22  ;;  %v2271_v5 = vmul.f32 %v2245_v18, %v1907_v29 }
 0x1ae   :  { %v2273_v60 = vrot.slane %v847_v57, %v851_v17  ;;  %v2277_v9 = vmul.f32 %v1891_v19, %v2245_v18  ;;  %v2281_v3 = vmul.f32 %v1903_v27, %v2245_v18  ;;  %v2285_v7 = vmul.f32 %v2245_v18, %v1924_v42  ;;  %v3540_v42 = vld [vmem:[#allocation8_spill] sm:$0xff] }
 0x1af   :  { %v2289_v22 = vmul.f32 %v2245_v18, %v1935_v49  ;;  %v2293_v29 = vmul.f32 %v1919_v39, %v2245_v18  ;;  %v2297_v19 = vmul.f32 %v1931_v47, %v2245_v18  ;;  %v2301_v27 = vmul.f32 %v2245_v18, %v3539_v40  ;;  %v3541_v49 = vld [vmem:[#allocation5_spill] sm:$0xff]  ;;  %v3542_v39 = vld [vmem:[#allocation7_spill] sm:$0xff]  ;;  %v3543_v47 = vld [vmem:[#allocation10_spill] sm:$0xff] }
 0x1b0   :  { %v1008_v51 = vadd.f32 %v2273_v60, %v927_v0  ;;  %v2306_v45 = vmul.f32 %v2245_v18, %v3540_v42  ;;  %v2310_v58 = vmul.f32 %v3541_v49, %v2245_v18  ;;  %v2314_v11 = vmul.f32 %v3542_v39, %v2245_v18  ;;  %v3550_v0 = vld [vmem:[#allocation13_spill] sm:$0xff]  ;;  %v3552_v42 = vld [vmem:[#allocation15_spill] sm:$0xff] }
 0x1b1   :  { %v2318_v16 = vmul.f32 %v2245_v18, %v3543_v47  ;;  %v2322_v34 = vmul.f32 %v2245_v18, %v3544_v37  ;;  %v2326_v13 = vmul.f32 %v3545_v59, %v2245_v18  ;;  %v2330_v17 = vmul.f32 %v3546_v55, %v2245_v18  ;;  %v3553_v39 = vld [vmem:[#allocation19_spill] sm:$0xff] }
 0x1b2   :  { %vm1083_vm1 = vcmp.gt.f32.partialorder %v1008_v51, 0.0  ;;  %v1158_v32 = vmul.f32 0.01, %v1008_v51  ;;  %v2334_v53 = vmul.f32 %v2245_v18, %v3547_v31  ;;  %v2338_v57 = vmul.f32 %v2245_v18, %v3548_v25  ;;  %v3555_v37 = vld [vmem:[#allocation23_spill] sm:$0xff]  ;;  %v3556_v31 = vld [vmem:[#allocation17_spill] sm:$0xff] }
 0x1b3   :  { %v2342_v40 = vmul.f32 %v3550_v0, %v2245_v18  ;;  %v2346_v49 = vmul.f32 %v3552_v42, %v2245_v18  ;;  %v2350_v47 = vmul.f32 %v2245_v18, %v3553_v39  ;;  %v2354_v59 = vmul.f32 %v2245_v18, %v3555_v37  ;;  %v3558_v0 = vld [vmem:[#allocation21_spill] sm:$0xff]  ;;  %v3561_v39 = vld [vmem:[#allocation31_spill] sm:$0xff] }
 0x1b4   :  { %3549 = vst [vmem:[#allocation6_spill] sm:$0xff] %v2338_v57  ;;  %v1233_v55 = vsel %vm1083_vm1, %v1008_v51, %v1158_v32  ;;  %v2358_v25 = vmul.f32 %v3556_v31, %v2245_v18  ;;  %v3560_v57 = vld [vmem:[#allocation27_spill] sm:$0xff]  ;;  %v3563_v37 = vld [vmem:[#allocation25_spill] sm:$0xff] }
 0x1b5   :  { %3551 = vst [vmem:[#allocation8_spill] sm:$0xff] %v2342_v40  ;;  %3554 = vst [vmem:[#allocation5_spill] sm:$0xff] %v2350_v47  ;;  %v2362_v40 = vmul.f32 %v3558_v0, %v2245_v18  ;;  %v2366_v42 = vmul.f32 %v2245_v18, %v3560_v57  ;;  %v2370_v47 = vmul.f32 %v2245_v18, %v3561_v39  ;;  %v3565_v32 = vld [vmem:[#allocation29_spill] sm:$0xff] }
 0x1b6   :  { %3557 = vst [vmem:[#allocation7_spill] sm:$0xff] %v2358_v25  ;;  %1308 = vst [vmem:[#allocation2 + $0x248] sm:$0xff] %v1233_v55  ;;  %v2374_v51 = vmul.f32 %v3563_v37, %v2245_v18  ;;  %v2378_v31 = vmul.f32 %v3565_v32, %v2245_v18  ;;  %v3567_v25 = vld [vmem:[#allocation34_spill] sm:$0xff]  ;;  %v3569_v55 = vld [vmem:[#allocation33_spill] sm:$0xff] }
 0x1b7   :  { %3559 = vst [vmem:[#allocation10_spill] sm:$0xff] %v2362_v40  ;;  %3562 = vst [vmem:[#allocation12_spill] sm:$0xff] %v2370_v47  ;;  %v2382_v0 = vmul.f32 %v2245_v18, %v3567_v25  ;;  %v3568_v40 = vld [vmem:[#allocation37_spill] sm:$0xff]  ;;  %v2390_v39 = vmul.f32 %v3569_v55, %v2245_v18  ;;  %v3570_v47 = vld [vmem:[#allocation36_spill] sm:$0xff]  ;;  %v2410_v55 = vmul.f32 %v2121_v62, %v2245_v18 }
 0x1b8   :  { %3564 = vst [vmem:[#allocation9_spill] sm:$0xff] %v2374_v51  ;;  %3566 = vst [vmem:[#allocation11_spill] sm:$0xff] %v2378_v31  ;;  %v2386_v57 = vmul.f32 %v2245_v18, %v3568_v40  ;;  %v2394_v37 = vmul.f32 %v3570_v47, %v2245_v18  ;;  %v3571_v51 = vld [vmem:[#allocation38_spill] sm:$0xff]  ;;  %v3572_v31 = vld [vmem:[#allocation39_spill] sm:$0xff]  ;;  %v2406_v40 = vmul.f32 %v2113_v54, %v2245_v18 }
 0x1b9   :  { %v2398_v32 = vmul.f32 %v2245_v18, %v3571_v51  ;;  %v2402_v25 = vmul.f32 %v2245_v18, %v3572_v31  ;;  %v2414_v47 = vmul.f32 %v2245_v18, %v1870_v6  ;;  %v2418_v51 = vmul.f32 %v2245_v18, %v1878_v10 }
 0x1ba   :  { %v2422_v31 = vmul.f32 %v1866_v4, %v2245_v18  ;;  %v2426_v54 = vmul.f32 %v1874_v8, %v2245_v18  ;;  %v2430_v62 = vmul.f32 %v2245_v18, %v1898_v23  ;;  %v2434_v6 = vmul.f32 %v2245_v18, %v1909_v30 }
 0x1bb   :  { %v2438_v10 = vmul.f32 %v1894_v21, %v2245_v18  ;;  %v2442_v4 = vmul.f32 %v1905_v28, %v2245_v18  ;;  %v2446_v8 = vmul.f32 %v2245_v18, %v1926_v43  ;;  %v2450_v23 = vmul.f32 %v2245_v18, %v1937_v50 }
 0x1bc   :  { %v2454_v30 = vmul.f32 %v1922_v41, %v2245_v18  ;;  %v2458_v21 = vmul.f32 %v1933_v48, %v2245_v18  ;;  %v2462_v28 = vmul.f32 %v2245_v18, %v1954_v63  ;;  %v2466_v43 = vmul.f32 %v2245_v18, %v1965_v14 }
 0x1bd   :  { %v2470_v50 = vmul.f32 %v1950_v61, %v2245_v18  ;;  %v2474_v41 = vmul.f32 %v1961_v12, %v2245_v18  ;;  %v2478_v48 = vmul.f32 %v2245_v18, %v1982_v35  ;;  %v2482_v63 = vmul.f32 %v2245_v18, %v1993_v46 }
 0x1be   :  { %v2486_v14 = vmul.f32 %v1978_v33, %v2245_v18  ;;  %v2490_v61 = vmul.f32 %v1989_v44, %v2245_v18  ;;  %v2494_v12 = vmul.f32 %v2245_v18, %v2010_v15  ;;  %v2498_v35 = vmul.f32 %v2245_v18, %v2021_v26 }
 0x1bf   :  { %v2502_v46 = vmul.f32 %v2006_v1, %v2245_v18  ;;  %v2506_v33 = vmul.f32 %v2017_v24, %v2245_v18 }
 0x1c0   :  { %3573 = vst [vmem:[#allocation14_spill] sm:$0xff] %v2486_v14  ;;  %3574 = vst [vmem:[#allocation16_spill] sm:$0xff] %v2490_v61  ;;  %v3579_v14 = vld [vmem:[#allocation20_spill] sm:$0xff] }
 0x1c1   :  { %3575 = vst [vmem:[#allocation13_spill] sm:$0xff] %v2494_v12  ;;  %3576 = vst [vmem:[#allocation15_spill] sm:$0xff] %v2498_v35  ;;  %v2510_v44 = vmul.f32 %v2245_v18, %v3579_v14  ;;  %v3581_v61 = vld [vmem:[#allocation24_spill] sm:$0xff]  ;;  %v3583_v12 = vld [vmem:[#allocation18_spill] sm:$0xff] }
 0x1c2   :  { %3577 = vst [vmem:[#allocation19_spill] sm:$0xff] %v2502_v46  ;;  %3578 = vst [vmem:[#allocation23_spill] sm:$0xff] %v2506_v33  ;;  %v2514_v15 = vmul.f32 %v2245_v18, %v3581_v61  ;;  %v2518_v26 = vmul.f32 %v3583_v12, %v2245_v18  ;;  %v3585_v35 = vld [vmem:[#allocation22_spill] sm:$0xff]  ;;  %v3586_v46 = vld [vmem:[#allocation28_spill] sm:$0xff] }
 0x1c3   :  { %3580 = vst [vmem:[#allocation17_spill] sm:$0xff] %v2510_v44  ;;  %v2522_v1 = vmul.f32 %v3585_v35, %v2245_v18  ;;  %v2526_v24 = vmul.f32 %v2245_v18, %v3586_v46  ;;  %v3587_v33 = vld [vmem:[#allocation32_spill] sm:$0xff]  ;;  %v3588_v44 = vld [vmem:[#allocation26_spill] sm:$0xff]  ;;  %v2546_v46 = vmul.f32 %v2090_v52, %v2245_v18  ;;  %v2566_v52 = vadd.f32 %v2273_v60, %v2267_v56 }
 0x1c4   :  { %3582 = vst [vmem:[#allocation21_spill] sm:$0xff] %v2514_v15  ;;  %3584 = vst [vmem:[#allocation27_spill] sm:$0xff] %v2518_v26  ;;  %v2530_v14 = vmul.f32 %v2245_v18, %v3587_v33  ;;  %v2534_v61 = vmul.f32 %v3588_v44, %v2245_v18  ;;  %v3589_v15 = vld [vmem:[#allocation30_spill] sm:$0xff]  ;;  %v3590_v26 = vld [vmem:[#allocation35_spill] sm:$0xff]  ;;  %v2550_v33 = vadd.f32 %v2273_v60, %v2251_v36 }
 0x1c5   :  { %v2538_v12 = vmul.f32 %v3589_v15, %v2245_v18  ;;  %v2542_v35 = vmul.f32 %v2245_v18, %v3590_v26  ;;  %v2554_v44 = vadd.f32 %v2273_v60, %v2255_v38  ;;  %v2558_v15 = vadd.f32 %v2273_v60, %v2259_v2 }
 0x1c6   :  { %v2562_v26 = vadd.f32 %v2273_v60, %v2263_v20  ;;  %v2570_v18 = vadd.f32 %v2273_v60, %v2271_v5  ;;  %v2574_v36 = vadd.f32 %v2273_v60, %v2277_v9  ;;  %v2578_v38 = vadd.f32 %v2273_v60, %v2281_v3 }
 0x1c7   :  { %v2582_v2 = vadd.f32 %v2273_v60, %v2285_v7  ;;  %v2586_v20 = vadd.f32 %v2273_v60, %v2289_v22  ;;  %v2590_v56 = vadd.f32 %v2273_v60, %v2293_v29  ;;  %v2594_v5 = vadd.f32 %v2273_v60, %v2297_v19 }
 0x1c8   :  { %v2598_v9 = vadd.f32 %v2273_v60, %v2301_v27  ;;  %v2602_v3 = vadd.f32 %v2273_v60, %v2306_v45  ;;  %v2606_v7 = vadd.f32 %v2273_v60, %v2310_v58  ;;  %v2610_v22 = vadd.f32 %v2273_v60, %v2314_v11  ;;  %v3594_v11 = vld [vmem:[#allocation6_spill] sm:$0xff] }
 0x1c9   :  { %v2614_v29 = vadd.f32 %v2273_v60, %v2318_v16  ;;  %v2618_v19 = vadd.f32 %v2273_v60, %v2322_v34  ;;  %v2622_v27 = vadd.f32 %v2273_v60, %v2326_v13  ;;  %v2626_v45 = vadd.f32 %v2273_v60, %v2330_v17 }
 0x1ca   :  { %v2630_v58 = vadd.f32 %v2273_v60, %v2334_v53  ;;  %v2634_v16 = vadd.f32 %v2273_v60, %v3594_v11  ;;  %v2642_v13 = vadd.f32 %v2273_v60, %v2346_v49  ;;  %v2650_v53 = vadd.f32 %v2273_v60, %v2354_v59 }
 0x1cb   :  { %3591 = vst [vmem:[#allocation31_spill] sm:$0xff] %v2614_v29  ;;  %3592 = vst [vmem:[#allocation25_spill] sm:$0xff] %v2622_v27  ;;  %v3596_v29 = vld [vmem:[#allocation8_spill] sm:$0xff]  ;;  %v3598_v27 = vld [vmem:[#allocation5_spill] sm:$0xff]  ;;  %v2662_v49 = vadd.f32 %v2273_v60, %v2366_v42  ;;  %v2682_v42 = vadd.f32 %v2273_v60, %v2386_v57  ;;  %v2702_v57 = vadd.f32 %v2273_v60, %v2406_v40  ;;  %vm1010_vm2 = vcmp.gt.f32.partialorder %v2550_v33, 0.0 }
 0x1cc   :  { %3593 = vst [vmem:[#allocation29_spill] sm:$0xff] %v2630_v58  ;;  %3595 = vst [vmem:[#allocation34_spill] sm:$0xff] %v2634_v16  ;;  %v2638_v34 = vadd.f32 %v2273_v60, %v3596_v29  ;;  %v2646_v17 = vadd.f32 %v2273_v60, %v3598_v27  ;;  %v3601_v58 = vld [vmem:[#allocation7_spill] sm:$0xff]  ;;  %v3602_v16 = vld [vmem:[#allocation10_spill] sm:$0xff]  ;;  %v2722_v40 = vadd.f32 %v2273_v60, %v2426_v54  ;;  %vm1011_vm3 = vcmp.gt.f32.partialorder %v2554_v44, 0.0 }
 0x1cd   :  { %3597 = vst [vmem:[#allocation37_spill] sm:$0xff] %v2642_v13  ;;  %3600 = vst [vmem:[#allocation36_spill] sm:$0xff] %v2650_v53  ;;  %v2654_v11 = vadd.f32 %v2273_v60, %v3601_v58  ;;  %v2658_v29 = vadd.f32 %v2273_v60, %v3602_v16  ;;  %v3603_v13 = vld [vmem:[#allocation12_spill] sm:$0xff]  ;;  %v3605_v53 = vld [vmem:[#allocation11_spill] sm:$0xff]  ;;  %v2678_v16 = vadd.f32 %v2273_v60, %v2382_v0  ;;  %vm1012_vm4 = vcmp.gt.f32.partialorder %v2558_v15, 0.0 }
 0x1ce   :  { %3599 = vst [vmem:[#allocation33_spill] sm:$0xff] %v2646_v17  ;;  %v2666_v27 = vadd.f32 %v2273_v60, %v3603_v13  ;;  %v3604_v17 = vld [vmem:[#allocation9_spill] sm:$0xff]  ;;  %v2674_v58 = vadd.f32 %v2273_v60, %v3605_v53  ;;  %v2686_v13 = vadd.f32 %v2273_v60, %v2390_v39  ;;  %v2694_v53 = vadd.f32 %v2273_v60, %v2398_v32 }
 0x1cf   :  { %v2670_v59 = vadd.f32 %v2273_v60, %v3604_v17  ;;  %v2690_v17 = vadd.f32 %v2273_v60, %v2394_v37  ;;  %v2698_v0 = vadd.f32 %v2273_v60, %v2402_v25  ;;  %v2706_v39 = vadd.f32 %v2273_v60, %v2410_v55 }
 0x1d0   :  { %v2710_v37 = vadd.f32 %v2273_v60, %v2414_v47  ;;  %v2714_v32 = vadd.f32 %v2273_v60, %v2418_v51  ;;  %v2718_v25 = vadd.f32 %v2273_v60, %v2422_v31  ;;  %v2726_v55 = vadd.f32 %v2273_v60, %v2430_v62 }
 0x1d1   :  { %v2730_v47 = vadd.f32 %v2273_v60, %v2434_v6  ;;  %v2734_v51 = vadd.f32 %v2273_v60, %v2438_v10  ;;  %v2738_v31 = vadd.f32 %v2273_v60, %v2442_v4  ;;  %v2742_v54 = vadd.f32 %v2273_v60, %v2446_v8 }
 0x1d2   :  { %3606 = vst [vmem:[#allocation38_spill] sm:$0xff] %v2718_v25  ;;  %v2746_v62 = vadd.f32 %v2273_v60, %v2450_v23  ;;  %v2750_v6 = vadd.f32 %v2273_v60, %v2454_v30  ;;  %v2754_v10 = vadd.f32 %v2273_v60, %v2458_v21  ;;  %v2758_v4 = vadd.f32 %v2273_v60, %v2462_v28 }
 0x1d3   :  { %3607 = vst [vmem:[#allocation39_spill] sm:$0xff] %v2730_v47  ;;  %3608 = vst [vmem:[#allocation20_spill] sm:$0xff] %v2734_v51  ;;  %v2762_v8 = vadd.f32 %v2273_v60, %v2466_v43  ;;  %v2766_v23 = vadd.f32 %v2273_v60, %v2470_v50  ;;  %v2770_v30 = vadd.f32 %v2273_v60, %v2474_v41  ;;  %vm1013_vm5 = vcmp.gt.f32.partialorder %v2562_v26, 0.0 }
 0x1d4   :  { %3609 = vst [vmem:[#allocation24_spill] sm:$0xff] %v2746_v62  ;;  %3610 = vst [vmem:[#allocation18_spill] sm:$0xff] %v2750_v6  ;;  %v2774_v21 = vadd.f32 %v2273_v60, %v2478_v48  ;;  %v2778_v28 = vadd.f32 %v2273_v60, %v2482_v63  ;;  %vm1014_vm6 = vcmp.gt.f32.partialorder %v2566_v52, 0.0  ;;  %vm1015_vm7 = vcmp.gt.f32.partialorder %v2570_v18, 0.0 }
 0x1d5   :  { %3611 = vst [vmem:[#allocation22_spill] sm:$0xff] %v2758_v4  ;;  %3612 = vst [vmem:[#allocation28_spill] sm:$0xff] %v2762_v8  ;;  %v3617_v4 = vld [vmem:[#allocation14_spill] sm:$0xff]  ;;  %v3619_v8 = vld [vmem:[#allocation16_spill] sm:$0xff]  ;;  %vm1016_vm8 = vcmp.gt.f32.partialorder %v2574_v36, 0.0  ;;  %vm1017_vm9 = vcmp.gt.f32.partialorder %v2578_v38, 0.0 }
 0x1d6   :  { %3613 = vst [vmem:[#allocation32_spill] sm:$0xff] %v2766_v23  ;;  %3614 = vst [vmem:[#allocation26_spill] sm:$0xff] %v2770_v30  ;;  %v2782_v43 = vadd.f32 %v2273_v60, %v3617_v4  ;;  %v2786_v50 = vadd.f32 %v2273_v60, %v3619_v8  ;;  %v3621_v23 = vld [vmem:[#allocation13_spill] sm:$0xff]  ;;  %v3623_v30 = vld [vmem:[#allocation15_spill] sm:$0xff]  ;;  %vm1018_vm10 = vcmp.gt.f32.partialorder %v2582_v2, 0.0  ;;  %vm1019_vm11 = vcmp.gt.f32.partialorder %v2586_v20, 0.0 }
 0x1d7   :  { %3615 = vst [vmem:[#allocation30_spill] sm:$0xff] %v2774_v21  ;;  %3616 = vst [vmem:[#allocation35_spill] sm:$0xff] %v2778_v28  ;;  %v2790_v41 = vadd.f32 %v2273_v60, %v3621_v23  ;;  %v2794_v48 = vadd.f32 %v2273_v60, %v3623_v30  ;;  %v3625_v21 = vld [vmem:[#allocation19_spill] sm:$0xff]  ;;  %vm1020_vm12 = vcmp.gt.f32.partialorder %v2590_v56, 0.0  ;;  %vm1021_vm13 = vcmp.gt.f32.partialorder %v2594_v5, 0.0 }
 0x1d8   :  { %3618 = vst [vmem:[#allocation6_spill] sm:$0xff] %v2782_v43  ;;  %3620 = vst [vmem:[#allocation8_spill] sm:$0xff] %v2786_v50  ;;  %v2798_v63 = vadd.f32 %v2273_v60, %v3625_v21  ;;  %v3627_v28 = vld [vmem:[#allocation23_spill] sm:$0xff]  ;;  %v3629_v43 = vld [vmem:[#allocation17_spill] sm:$0xff]  ;;  %v2818_v21 = vadd.f32 %v2273_v60, %v2522_v1  ;;  %v2838_v1 = vadd.f32 %v2273_v60, %v2542_v35  ;;  %v1089_v35 = vmul.f32 0.01, %v2566_v52 }
 0x1d9   :  { %3622 = vst [vmem:[#allocation5_spill] sm:$0xff] %v2790_v41  ;;  %3624 = vst [vmem:[#allocation7_spill] sm:$0xff] %v2794_v48  ;;  %v2802_v4 = vadd.f32 %v2273_v60, %v3627_v28  ;;  %v2806_v8 = vadd.f32 %v2273_v60, %v3629_v43  ;;  %v3631_v50 = vld [vmem:[#allocation21_spill] sm:$0xff]  ;;  %v3633_v41 = vld [vmem:[#allocation27_spill] sm:$0xff]  ;;  %v2822_v28 = vadd.f32 %v2273_v60, %v2526_v24  ;;  %vm1022_vm14 = vcmp.gt.f32.partialorder %v2598_v9, 0.0 }
 0x1da   :  { %3626 = vst [vmem:[#allocation10_spill] sm:$0xff] %v2798_v63  ;;  %v2810_v23 = vadd.f32 %v2273_v60, %v3631_v50  ;;  %v2814_v30 = vadd.f32 %v2273_v60, %v3633_v41  ;;  %3635 = vst [vmem:[#allocation16_spill] sm:$0xff] %v2818_v21  ;;  %v2826_v43 = vadd.f32 %v2273_v60, %v2530_v14  ;;  %v1086_v14 = vmul.f32 0.01, %v2554_v44 }
 0x1db   :  { %3628 = vst [vmem:[#allocation12_spill] sm:$0xff] %v2802_v4  ;;  %3630 = vst [vmem:[#allocation9_spill] sm:$0xff] %v2806_v8  ;;  %v2830_v50 = vadd.f32 %v2273_v60, %v2534_v61  ;;  %v2834_v41 = vadd.f32 %v2273_v60, %v2538_v12  ;;  %v2842_v24 = vadd.f32 %v2273_v60, %v2546_v46  ;;  %v1085_v60 = vmul.f32 0.01, %v2550_v33 }
 0x1dc   :  { %3632 = vst [vmem:[#allocation11_spill] sm:$0xff] %v2810_v23  ;;  %3634 = vst [vmem:[#allocation14_spill] sm:$0xff] %v2814_v30  ;;  %v1087_v61 = vmul.f32 0.01, %v2558_v15  ;;  %v1088_v12 = vmul.f32 0.01, %v2562_v26  ;;  %v1161_v21 = vsel %vm1011_vm3, %v2554_v44, %v1086_v14  ;;  %v1164_v48 = vsel %vm1014_vm6, %v2566_v52, %v1089_v35 }
 0x1dd   :  { %3636 = vst [vmem:[#allocation13_spill] sm:$0xff] %v2822_v28  ;;  %3637 = vst [vmem:[#allocation15_spill] sm:$0xff] %v2826_v43  ;;  %v1090_v46 = vmul.f32 0.01, %v2570_v18  ;;  %v1094_v43 = vmul.f32 0.01, %v2586_v20 }
 0x1de   :  { %3638 = vst [vmem:[#allocation19_spill] sm:$0xff] %v2830_v50  ;;  %3639 = vst [vmem:[#allocation23_spill] sm:$0xff] %v2834_v41  ;;  %v1160_v41 = vsel %vm1010_vm2, %v2550_v33, %v1085_v60  ;;  %v1093_v50 = vmul.f32 0.01, %v2582_v2  ;;  %v1095_v28 = vmul.f32 0.01, %v2590_v56  ;;  %v1162_v60 = vsel %vm1012_vm4, %v2558_v15, %v1087_v61 }
 0x1df   :  { %3640 = vst [vmem:[#allocation17_spill] sm:$0xff] %v2838_v1  ;;  %3641 = vst [vmem:[#allocation21_spill] sm:$0xff] %v2842_v24  ;;  %v1091_v24 = vmul.f32 0.01, %v2574_v36  ;;  %v1092_v1 = vmul.f32 0.01, %v2578_v38  ;;  %v1163_v4 = vsel %vm1013_vm5, %v2562_v26, %v1088_v12 }
 0x1e0   :  { %1235 = vst [vmem:[#allocation2] sm:$0xff] %v1160_v41  ;;  %vm1023_vm15 = vcmp.gt.f32.partialorder %v2602_v3, 0.0  ;;  %v1096_v30 = vmul.f32 0.01, %v2594_v5  ;;  %v2877_v23 = vmul.f32 0.01, %v2598_v9 }
 0x1e1   :  { %v2880_v33 = vmul.f32 0.01, %v2602_v3  ;;  %1236 = vst [vmem:[#allocation2 + $0x8] sm:$0xff] %v1161_v21  ;;  %vm1024_vm0 = vcmp.gt.f32.partialorder %v2606_v7, 0.0  ;;  %v2887_v44 = vmul.f32 0.01, %v2606_v7 }
 0x1e2   :  { %v2890_v41 = vmul.f32 0.01, %v2610_v22  ;;  %v3642_v14 = vld [vmem:[#allocation31_spill] sm:$0xff]  ;;  %1237 = vst [vmem:[#allocation2 + $0x10] sm:$0xff] %v1162_v60  ;;  %vm1025_vm1 = vcmp.gt.f32.partialorder %v2610_v22, 0.0  ;;  %v3645_v21 = vld [vmem:[#allocation25_spill] sm:$0xff] }
 0x1e3   :  { %v2893_v8 = vmul.f32 0.01, %v3642_v14  ;;  %v2900_v15 = vmul.f32 0.01, %v2618_v19  ;;  %v2903_v61 = vmul.f32 0.01, %v3645_v21 }
 0x1e4   :  { %v2906_v63 = vmul.f32 0.01, %v2626_v45  ;;  %1238 = vst [vmem:[#allocation2 + $0x18] sm:$0xff] %v1163_v4  ;;  %vm1026_vm2 = vcmp.gt.f32.partialorder %v3642_v14, 0.0  ;;  %v3648_v26 = vld [vmem:[#allocation29_spill] sm:$0xff]  ;;  %v3650_v60 = vld [vmem:[#allocation34_spill] sm:$0xff] }
 0x1e5   :  { %3643 = vst [vmem:[#allocation27_spill] sm:$0xff] %v2893_v8  ;;  %3644 = vst [vmem:[#allocation40_spill] sm:$0xff] %v2900_v15  ;;  %v2913_v12 = vmul.f32 0.01, %v3648_v26  ;;  %v2916_v8 = vmul.f32 0.01, %v3650_v60 }
 0x1e6   :  { %3646 = vst [vmem:[#allocation25_spill] sm:$0xff] %v2903_v61  ;;  %3647 = vst [vmem:[#allocation41_spill] sm:$0xff] %v2906_v63  ;;  %v2919_v15 = vmul.f32 0.01, %v2638_v34  ;;  %v1165_v63 = vsel %vm1015_vm7, %v2570_v18, %v1090_v46  ;;  %vm1027_vm3 = vcmp.gt.f32.partialorder %v2618_v19, 0.0  ;;  %v3652_v52 = vld [vmem:[#allocation37_spill] sm:$0xff] }
 0x1e7   :  { %3649 = vst [vmem:[#allocation29_spill] sm:$0xff] %v2913_v12  ;;  %1239 = vst [vmem:[#allocation2 + $0x20] sm:$0xff] %v1164_v48  ;;  %v2926_v4 = vmul.f32 0.01, %v3652_v52  ;;  %v3653_v35 = vld [vmem:[#allocation33_spill] sm:$0xff]  ;;  %v3654_v12 = vld [vmem:[#allocation36_spill] sm:$0xff] }
 0x1e8   :  { %3651 = vst [vmem:[#allocation34_spill] sm:$0xff] %v2919_v15  ;;  %v2929_v61 = vmul.f32 0.01, %v3653_v35  ;;  %v2932_v14 = vmul.f32 0.01, %v3654_v12  ;;  %v1166_v15 = vsel %vm1016_vm8, %v2574_v36, %v1091_v24  ;;  %1240 = vst [vmem:[#allocation2 + $0x28] sm:$0xff] %v1165_v63 }
 0x1e9   :  { %vm1028_vm4 = vcmp.gt.f32.partialorder %v3645_v21, 0.0  ;;  %v2939_v18 = vmul.f32 0.01, %v2654_v11  ;;  %v2942_v48 = vmul.f32 0.01, %v2658_v29  ;;  %1241 = vst [vmem:[#allocation2 + $0x30] sm:$0xff] %v1166_v15 }
 0x1ea   :  { %3655 = vst [vmem:[#allocation37_spill] sm:$0xff] %v2932_v14  ;;  %v2945_v46 = vmul.f32 0.01, %v2662_v49  ;;  %v1167_v14 = vsel %vm1017_vm9, %v2578_v38, %v1092_v1  ;;  %vm1029_vm5 = vcmp.gt.f32.partialorder %v2626_v45, 0.0  ;;  %v2952_v36 = vmul.f32 0.01, %v2666_v27 }
 0x1eb   :  { %v2955_v63 = vmul.f32 0.01, %v2670_v59  ;;  %v2958_v24 = vmul.f32 0.01, %v2674_v58  ;;  %1242 = vst [vmem:[#allocation2 + $0x38] sm:$0xff] %v1167_v14  ;;  %vm1030_vm6 = vcmp.gt.f32.partialorder %v3648_v26, 0.0 }
 0x1ec   :  { %3656 = vst [vmem:[#allocation33_spill] sm:$0xff] %v2945_v46  ;;  %v1168_v46 = vsel %vm1018_vm10, %v2582_v2, %v1093_v50  ;;  %v2965_v38 = vmul.f32 0.01, %v2678_v16  ;;  %v2968_v1 = vmul.f32 0.01, %v2682_v42  ;;  %vm1031_vm7 = vcmp.gt.f32.partialorder %v3650_v60, 0.0 }
 0x1ed   :  { %3657 = vst [vmem:[#allocation36_spill] sm:$0xff] %v2958_v24  ;;  %v2971_v15 = vmul.f32 0.01, %v2686_v13  ;;  %v1169_v24 = vsel %vm1019_vm11, %v2586_v20, %v1094_v43  ;;  %1243 = vst [vmem:[#allocation2 + $0x40] sm:$0xff] %v1168_v46  ;;  %v2978_v2 = vmul.f32 0.01, %v2690_v17 }
 0x1ee   :  { %v2981_v50 = vmul.f32 0.01, %v2694_v53  ;;  %v2984_v14 = vmul.f32 0.01, %v2698_v0  ;;  %1244 = vst [vmem:[#allocation2 + $0x48] sm:$0xff] %v1169_v24  ;;  %vm1032_vm8 = vcmp.gt.f32.partialorder %v2638_v34, 0.0 }
 0x1ef   :  { %3658 = vst [vmem:[#allocation42_spill] sm:$0xff] %v2971_v15  ;;  %v1170_v15 = vsel %vm1020_vm12, %v2590_v56, %v1095_v28  ;;  %v2991_v20 = vmul.f32 0.01, %v2702_v57  ;;  %v2994_v43 = vmul.f32 0.01, %v2706_v39  ;;  %vm1033_vm9 = vcmp.gt.f32.partialorder %v3652_v52, 0.0 }
 0x1f0   :  { %3659 = vst [vmem:[#allocation43_spill] sm:$0xff] %v2984_v14  ;;  %v2997_v46 = vmul.f32 0.01, %v2710_v37  ;;  %v1171_v14 = vsel %vm1021_vm13, %v2594_v5, %v1096_v30  ;;  %1245 = vst [vmem:[#allocation2 + $0x50] sm:$0xff] %v1170_v15  ;;  %v3007_v56 = vmul.f32 0.01, %v2714_v32  ;;  %v1172_v5 = vsel %vm1022_vm14, %v2598_v9, %v2877_v23 }
 0x1f1   :  { %v3010_v28 = vmul.f32 0.01, %v2718_v25  ;;  %v3013_v24 = vmul.f32 0.01, %v2722_v40  ;;  %1246 = vst [vmem:[#allocation2 + $0x58] sm:$0xff] %v1171_v14  ;;  %vm1037_vm13 = vcmp.gt.f32.partialorder %v2658_v29, 0.0  ;;  %v1173_v9 = vsel %vm1023_vm15, %v2602_v3, %v2880_v33 }
 0x1f2   :  { %v3024_v30 = vmul.f32 0.01, %v2726_v55  ;;  %v3027_v15 = vmul.f32 0.01, %v2730_v47  ;;  %1247 = vst [vmem:[#allocation2 + $0x60] sm:$0xff] %v1172_v5  ;;  %vm1041_vm14 = vcmp.gt.f32.partialorder %v2674_v58, 0.0  ;;  %v1174_v3 = vsel %vm1024_vm0, %v2606_v7, %v2887_v44 }
 0x1f3   :  { %3660 = vst [vmem:[#allocation44_spill] sm:$0xff] %v3010_v28  ;;  %3661 = vst [vmem:[#allocation45_spill] sm:$0xff] %v3013_v24  ;;  %v3030_v24 = vmul.f32 0.01, %v2734_v51  ;;  %v3041_v23 = vmul.f32 0.01, %v2738_v31  ;;  %v1175_v7 = vsel %vm1025_vm1, %v2610_v22, %v2890_v41 }
 0x1f4   :  { %3662 = vst [vmem:[#allocation46_spill] sm:$0xff] %v3024_v30  ;;  %3663 = vst [vmem:[#allocation47_spill] sm:$0xff] %v3027_v15  ;;  %v3044_v14 = vmul.f32 0.01, %v2742_v54  ;;  %vm1045_vm15 = vcmp.gt.f32.partialorder %v2690_v17, 0.0  ;;  %vm1049_vm0 = vcmp.gt.f32.partialorder %v2706_v39, 0.0 }
 0x1f5   :  { %3664 = vst [vmem:[#allocation48_spill] sm:$0xff] %v3030_v24  ;;  %3665 = vst [vmem:[#allocation49_spill] sm:$0xff] %v3041_v23  ;;  %v3047_v24 = vmul.f32 0.01, %v2746_v62  ;;  %v3058_v33 = vmul.f32 0.01, %v2750_v6 }
 0x1f6   :  { %3666 = vst [vmem:[#allocation50_spill] sm:$0xff] %v3044_v14  ;;  %1248 = vst [vmem:[#allocation2 + $0x68] sm:$0xff] %v1173_v9  ;;  %v3061_v5 = vmul.f32 0.01, %v2754_v10  ;;  %v3672_v44 = vld [vmem:[#allocation28_spill] sm:$0xff]  ;;  %v3678_v15 = vld [vmem:[#allocation27_spill] sm:$0xff] }
 0x1f7   :  { %3667 = vst [vmem:[#allocation51_spill] sm:$0xff] %v3047_v24  ;;  %3668 = vst [vmem:[#allocation52_spill] sm:$0xff] %v3058_v33  ;;  %v3670_v24 = vld [vmem:[#allocation22_spill] sm:$0xff]  ;;  %v3075_v9 = vmul.f32 0.01, %v3672_v44  ;;  %v3679_v22 = vld [vmem:[#allocation31_spill] sm:$0xff] }
 0x1f8   :  { %3669 = vst [vmem:[#allocation53_spill] sm:$0xff] %v3061_v5  ;;  %v3064_v14 = vmul.f32 0.01, %v3670_v24  ;;  %1249 = vst [vmem:[#allocation2 + $0x70] sm:$0xff] %v1174_v3  ;;  %v3674_v5 = vld [vmem:[#allocation32_spill] sm:$0xff]  ;;  %v1176_v41 = vsel %vm1026_vm2, %v3679_v22, %v3678_v15  ;;  %vm1053_vm1 = vcmp.gt.f32.partialorder %v2722_v40, 0.0 }
 0x1f9   :  { %3673 = vst [vmem:[#allocation54_spill] sm:$0xff] %v3075_v9  ;;  %v3078_v33 = vmul.f32 0.01, %v3674_v5  ;;  %1250 = vst [vmem:[#allocation2 + $0x78] sm:$0xff] %v1175_v7  ;;  %v3680_v3 = vld [vmem:[#allocation30_spill] sm:$0xff]  ;;  %v3686_v28 = vld [vmem:[#allocation40_spill] sm:$0xff] }
 0x1fa   :  { %3671 = vst [vmem:[#allocation22_spill] sm:$0xff] %v3064_v14  ;;  %v3676_v14 = vld [vmem:[#allocation26_spill] sm:$0xff]  ;;  %v3092_v9 = vmul.f32 0.01, %v3680_v3  ;;  %v1177_v15 = vsel %vm1027_vm3, %v2618_v19, %v3686_v28  ;;  %1251 = vst [vmem:[#allocation2 + $0x80] sm:$0xff] %v1176_v41  ;;  %vm1057_vm2 = vcmp.gt.f32.partialorder %v2738_v31, 0.0 }
 0x1fb   :  { %3675 = vst [vmem:[#allocation55_spill] sm:$0xff] %v3078_v33  ;;  %v3081_v23 = vmul.f32 0.01, %v3676_v14  ;;  %v3682_v33 = vld [vmem:[#allocation35_spill] sm:$0xff]  ;;  %v3687_v7 = vld [vmem:[#allocation8_spill] sm:$0xff]  ;;  %v3693_v47 = vld [vmem:[#allocation25_spill] sm:$0xff] }
 0x1fc   :  { %3681 = vst [vmem:[#allocation27_spill] sm:$0xff] %v3092_v9  ;;  %v3095_v30 = vmul.f32 0.01, %v3682_v33  ;;  %v3109_v22 = vmul.f32 0.01, %v3687_v7  ;;  %v1178_v19 = vsel %vm1028_vm4, %v3645_v21, %v3693_v47  ;;  %1252 = vst [vmem:[#allocation2 + $0x88] sm:$0xff] %v1177_v15 }
 0x1fd   :  { %3677 = vst [vmem:[#allocation26_spill] sm:$0xff] %v3081_v23  ;;  %v3684_v23 = vld [vmem:[#allocation6_spill] sm:$0xff]  ;;  %vm1061_vm3 = vcmp.gt.f32.partialorder %v2754_v10, 0.0  ;;  %v3700_v62 = vld [vmem:[#allocation41_spill] sm:$0xff]  ;;  %1253 = vst [vmem:[#allocation2 + $0x90] sm:$0xff] %v1178_v19  ;;  %vm1065_vm4 = vcmp.gt.f32.partialorder %v3676_v14, 0.0 }
 0x1fe   :  { %3683 = vst [vmem:[#allocation31_spill] sm:$0xff] %v3095_v30  ;;  %v3098_v25 = vmul.f32 0.01, %v3684_v23  ;;  %3688 = vst [vmem:[#allocation35_spill] sm:$0xff] %v3109_v22  ;;  %v3689_v30 = vld [vmem:[#allocation5_spill] sm:$0xff]  ;;  %v3694_v28 = vld [vmem:[#allocation10_spill] sm:$0xff]  ;;  %v1179_v47 = vsel %vm1029_vm5, %v2626_v45, %v3700_v62 }
 0x1ff   :  { %v3112_v9 = vmul.f32 0.01, %v3689_v30  ;;  %v3126_v41 = vmul.f32 0.01, %v3694_v28  ;;  %v3701_v21 = vld [vmem:[#allocation11_spill] sm:$0xff]  ;;  %v3707_v44 = vld [vmem:[#allocation29_spill] sm:$0xff] }
 0x200   :  { %3685 = vst [vmem:[#allocation30_spill] sm:$0xff] %v3098_v25  ;;  %v3691_v25 = vld [vmem:[#allocation7_spill] sm:$0xff]  ;;  %v3143_v15 = vmul.f32 0.01, %v3701_v21  ;;  %v1180_v45 = vsel %vm1030_vm6, %v3648_v26, %v3707_v44  ;;  %1254 = vst [vmem:[#allocation2 + $0x98] sm:$0xff] %v1179_v47  ;;  %vm1069_vm5 = vcmp.gt.f32.partialorder %v3687_v7, 0.0  ;;  %v1181_v26 = vsel %vm1031_vm7, %v3650_v60, %v2916_v8 }
 0x201   :  { %3690 = vst [vmem:[#allocation40_spill] sm:$0xff] %v3112_v9  ;;  %v3115_v51 = vmul.f32 0.01, %v3691_v25  ;;  %3695 = vst [vmem:[#allocation5_spill] sm:$0xff] %v3126_v41  ;;  %v3696_v9 = vld [vmem:[#allocation12_spill] sm:$0xff]  ;;  %v3708_v62 = vld [vmem:[#allocation13_spill] sm:$0xff]  ;;  %v1183_v60 = vsel %vm1033_vm9, %v3652_v52, %v2926_v4 }
 0x202   :  { %v3129_v22 = vmul.f32 0.01, %v3696_v9  ;;  %v3160_v19 = vmul.f32 0.01, %v3708_v62  ;;  %1255 = vst [vmem:[#allocation2 + $0xa0] sm:$0xff] %v1180_v45  ;;  %v3714_v44 = vld [vmem:[#allocation23_spill] sm:$0xff] }
 0x203   :  { %3692 = vst [vmem:[#allocation8_spill] sm:$0xff] %v3115_v51  ;;  %v3698_v51 = vld [vmem:[#allocation9_spill] sm:$0xff]  ;;  %v3177_v47 = vmul.f32 0.01, %v3714_v44  ;;  %v3717_v25 = vld [vmem:[#allocation34_spill] sm:$0xff]  ;;  %1256 = vst [vmem:[#allocation2 + $0xa8] sm:$0xff] %v1181_v26 }
 0x204   :  { %3697 = vst [vmem:[#allocation25_spill] sm:$0xff] %v3129_v22  ;;  %v3132_v6 = vmul.f32 0.01, %v3698_v51  ;;  %3702 = vst [vmem:[#allocation9_spill] sm:$0xff] %v3143_v15  ;;  %v3703_v22 = vld [vmem:[#allocation14_spill] sm:$0xff]  ;;  %v1182_v8 = vsel %vm1032_vm8, %v2638_v34, %v3717_v25  ;;  %vm3718_vm6 = vcmp.gt.f32.partialorder %v3653_v35, 0.0 }
 0x205   :  { %v3146_v41 = vmul.f32 0.01, %v3703_v22  ;;  %3709 = vst [vmem:[#allocation14_spill] sm:$0xff] %v3160_v19  ;;  %v1184_v45 = vsel %vm3718_vm6, %v3653_v35, %v2929_v61  ;;  %v3719_v34 = vld [vmem:[#allocation37_spill] sm:$0xff]  ;;  %vm3720_vm8 = vcmp.gt.f32.partialorder %v3654_v12, 0.0  ;;  %vm3721_vm10 = vcmp.gt.f32.partialorder %v2654_v11, 0.0 }
 0x206   :  { %3699 = vst [vmem:[#allocation12_spill] sm:$0xff] %v3132_v6  ;;  %v3705_v6 = vld [vmem:[#allocation16_spill] sm:$0xff]  ;;  %v1185_v25 = vsel %vm3720_vm8, %v3654_v12, %v3719_v34  ;;  %v1186_v26 = vsel %vm3721_vm10, %v2654_v11, %v2939_v18  ;;  %1257 = vst [vmem:[#allocation2 + $0xb0] sm:$0xff] %v1182_v8  ;;  %vm1081_vm11 = vcmp.gt.f32.partialorder %v3714_v44, 0.0  ;;  %v1187_v61 = vsel %vm1037_vm13, %v2658_v29, %v2942_v48  ;;  %v3722_v52 = vld [vmem:[#allocation33_spill] sm:$0xff] }
 0x207   :  { %3704 = vst [vmem:[#allocation41_spill] sm:$0xff] %v3146_v41  ;;  %v3149_v5 = vmul.f32 0.01, %v3705_v6  ;;  %v3710_v41 = vld [vmem:[#allocation15_spill] sm:$0xff]  ;;  %vm1077_vm7 = vcmp.gt.f32.partialorder %v3705_v6, 0.0  ;;  %vm3723_vm6 = vcmp.gt.f32.partialorder %v2662_v49, 0.0 }
 0x208   :  { %v3163_v15 = vmul.f32 0.01, %v3710_v41  ;;  %v1188_v12 = vsel %vm3723_vm6, %v2662_v49, %v3722_v52  ;;  %vm3724_vm10 = vcmp.gt.f32.partialorder %v2666_v27, 0.0  ;;  %vm3725_vm8 = vcmp.gt.f32.partialorder %v2670_v59, 0.0  ;;  %1258 = vst [vmem:[#allocation2 + $0xb8] sm:$0xff] %v1183_v60  ;;  %1259 = vst [vmem:[#allocation2 + $0xc0] sm:$0xff] %v1184_v45 }
 0x209   :  { %3706 = vst [vmem:[#allocation11_spill] sm:$0xff] %v3149_v5  ;;  %v3712_v5 = vld [vmem:[#allocation19_spill] sm:$0xff]  ;;  %v1189_v11 = vsel %vm3724_vm10, %v2666_v27, %v2952_v36  ;;  %v1190_v4 = vsel %vm3725_vm8, %v2670_v59, %v2955_v63  ;;  %1260 = vst [vmem:[#allocation2 + $0xc8] sm:$0xff] %v1185_v25  ;;  %v3726_v29 = vld [vmem:[#allocation36_spill] sm:$0xff]  ;;  %vm3727_vm13 = vcmp.gt.f32.partialorder %v2678_v16, 0.0  ;;  %vm3728_vm6 = vcmp.gt.f32.partialorder %v2682_v42, 0.0 }
 0x20a   :  { %3711 = vst [vmem:[#allocation16_spill] sm:$0xff] %v3163_v15  ;;  %v3166_v23 = vmul.f32 0.01, %v3712_v5  ;;  %v3715_v15 = vld [vmem:[#allocation17_spill] sm:$0xff]  ;;  %1261 = vst [vmem:[#allocation2 + $0xd0] sm:$0xff] %v1186_v26  ;;  %v1191_v35 = vsel %vm1041_vm14, %v2674_v58, %v3726_v29  ;;  %v1192_v49 = vsel %vm3727_vm13, %v2678_v16, %v2965_v38  ;;  %v1193_v27 = vsel %vm3728_vm6, %v2682_v42, %v2968_v1  ;;  %v3729_v59 = vld [vmem:[#allocation42_spill] sm:$0xff] }
 0x20b   :  { %v3180_v19 = vmul.f32 0.01, %v3715_v15  ;;  %vm1082_vm9 = vcmp.gt.f32.partialorder %v3715_v15, 0.0  ;;  %vm3730_vm10 = vcmp.gt.f32.partialorder %v2686_v13, 0.0  ;;  %1262 = vst [vmem:[#allocation2 + $0xd8] sm:$0xff] %v1187_v61  ;;  %1263 = vst [vmem:[#allocation2 + $0xe0] sm:$0xff] %v1188_v12  ;;  %v1195_v58 = vsel %vm1045_vm15, %v2690_v17, %v2978_v2 }
 0x20c   :  { %3713 = vst [vmem:[#allocation29_spill] sm:$0xff] %v3166_v23  ;;  %v3716_v23 = vld [vmem:[#allocation21_spill] sm:$0xff]  ;;  %v1194_v18 = vsel %vm3730_vm10, %v2686_v13, %v3729_v59  ;;  %1264 = vst [vmem:[#allocation2 + $0xe8] sm:$0xff] %v1189_v11  ;;  %vm3731_vm14 = vcmp.gt.f32.partialorder %v2694_v53, 0.0  ;;  %v3732_v42 = vld [vmem:[#allocation43_spill] sm:$0xff]  ;;  %vm3733_vm8 = vcmp.gt.f32.partialorder %v2698_v0, 0.0  ;;  %v1199_v17 = vsel %vm1049_vm0, %v2706_v39, %v2994_v43 }
 0x20d   :  { %v3183_v28 = vmul.f32 0.01, %v3716_v23  ;;  %vm1084_vm12 = vcmp.gt.f32.partialorder %v3716_v23, 0.0  ;;  %1265 = vst [vmem:[#allocation2 + $0xf0] sm:$0xff] %v1190_v4  ;;  %v1196_v16 = vsel %vm3731_vm14, %v2694_v53, %v2981_v50  ;;  %v1197_v48 = vsel %vm3733_vm8, %v2698_v0, %v3732_v42  ;;  %1266 = vst [vmem:[#allocation2 + $0xf8] sm:$0xff] %v1191_v35  ;;  %v3738_v36 = vld [vmem:[#allocation38_spill] sm:$0xff] }
 0x20e   :  { %vm3734_vm13 = vcmp.gt.f32.partialorder %v2702_v57, 0.0  ;;  %1267 = vst [vmem:[#allocation2 + $0x100] sm:$0xff] %v1192_v49  ;;  %1268 = vst [vmem:[#allocation2 + $0x108] sm:$0xff] %v1193_v27  ;;  %vm3735_vm15 = vcmp.gt.f32.partialorder %v2710_v37, 0.0  ;;  %vm3736_vm6 = vcmp.gt.f32.partialorder %v2714_v32, 0.0  ;;  %vm3739_vm10 = vcmp.gt.f32.partialorder %v3738_v36, 0.0 }
 0x20f   :  { %v1198_v13 = vsel %vm3734_vm13, %v2702_v57, %v2991_v20  ;;  %1269 = vst [vmem:[#allocation2 + $0x110] sm:$0xff] %v1194_v18  ;;  %v1200_v53 = vsel %vm3735_vm15, %v2710_v37, %v2997_v46  ;;  %v1201_v0 = vsel %vm3736_vm6, %v2714_v32, %v3007_v56  ;;  %v3737_v57 = vld [vmem:[#allocation44_spill] sm:$0xff]  ;;  %1270 = vst [vmem:[#allocation2 + $0x118] sm:$0xff] %v1195_v58  ;;  %v3740_v39 = vld [vmem:[#allocation45_spill] sm:$0xff]  ;;  %vm3742_vm0 = vcmp.gt.f32.partialorder %v2726_v55, 0.0 }
 0x210   :  { %v1202_v63 = vsel %vm3739_vm10, %v3738_v36, %v3737_v57  ;;  %1271 = vst [vmem:[#allocation2 + $0x120] sm:$0xff] %v1196_v16  ;;  %1272 = vst [vmem:[#allocation2 + $0x128] sm:$0xff] %v1197_v48  ;;  %v1203_v38 = vsel %vm1053_vm1, %v2722_v40, %v3740_v39  ;;  %v3741_v37 = vld [vmem:[#allocation46_spill] sm:$0xff]  ;;  %v3743_v32 = vld [vmem:[#allocation47_spill] sm:$0xff]  ;;  %vm3751_vm1 = vcmp.gt.f32.partialorder %v2742_v54, 0.0 }
 0x211   :  { %1273 = vst [vmem:[#allocation2 + $0x130] sm:$0xff] %v1198_v13  ;;  %v1204_v1 = vsel %vm3742_vm0, %v2726_v55, %v3741_v37  ;;  %v3744_v2 = vld [vmem:[#allocation39_spill] sm:$0xff]  ;;  %v3746_v20 = vld [vmem:[#allocation48_spill] sm:$0xff]  ;;  %1274 = vst [vmem:[#allocation2 + $0x138] sm:$0xff] %v1199_v17  ;;  %vm3771_vm0 = vcmp.gt.f32.partialorder %v3682_v33, 0.0 }
 0x212   :  { %vm3745_vm14 = vcmp.gt.f32.partialorder %v3744_v2, 0.0  ;;  %v3747_v43 = vld [vmem:[#allocation20_spill] sm:$0xff]  ;;  %1275 = vst [vmem:[#allocation2 + $0x140] sm:$0xff] %v1200_v53  ;;  %1276 = vst [vmem:[#allocation2 + $0x148] sm:$0xff] %v1201_v0  ;;  %v3749_v40 = vld [vmem:[#allocation49_spill] sm:$0xff] }
 0x213   :  { %v1205_v50 = vsel %vm3745_vm14, %v3744_v2, %v3743_v32  ;;  %vm3748_vm8 = vcmp.gt.f32.partialorder %v3747_v43, 0.0  ;;  %1277 = vst [vmem:[#allocation2 + $0x150] sm:$0xff] %v1202_v63  ;;  %v1207_v56 = vsel %vm1057_vm2, %v2738_v31, %v3749_v40  ;;  %v3750_v55 = vld [vmem:[#allocation50_spill] sm:$0xff]  ;;  %v3752_v60 = vld [vmem:[#allocation51_spill] sm:$0xff]  ;;  %v3753_v45 = vld [vmem:[#allocation24_spill] sm:$0xff]  ;;  %vm3760_vm2 = vcmp.gt.f32.partialorder %v3670_v24, 0.0 }
 0x214   :  { %v1206_v46 = vsel %vm3748_vm8, %v3747_v43, %v3746_v20  ;;  %v1208_v8 = vsel %vm3751_vm1, %v2742_v54, %v3750_v55  ;;  %vm3754_vm13 = vcmp.gt.f32.partialorder %v3753_v45, 0.0  ;;  %v3755_v25 = vld [vmem:[#allocation52_spill] sm:$0xff]  ;;  %v3756_v26 = vld [vmem:[#allocation18_spill] sm:$0xff]  ;;  %1278 = vst [vmem:[#allocation2 + $0x158] sm:$0xff] %v1203_v38  ;;  %1279 = vst [vmem:[#allocation2 + $0x160] sm:$0xff] %v1204_v1 }
 0x215   :  { %v1209_v34 = vsel %vm3754_vm13, %v3753_v45, %v3752_v60  ;;  %vm3757_vm15 = vcmp.gt.f32.partialorder %v3756_v26, 0.0  ;;  %1280 = vst [vmem:[#allocation2 + $0x168] sm:$0xff] %v1205_v50  ;;  %1281 = vst [vmem:[#allocation2 + $0x170] sm:$0xff] %v1206_v46  ;;  %v3758_v31 = vld [vmem:[#allocation53_spill] sm:$0xff]  ;;  %v3759_v54 = vld [vmem:[#allocation22_spill] sm:$0xff]  ;;  %vm3787_vm13 = vcmp.gt.f32.partialorder %v3698_v51, 0.0 }
 0x216   :  { %v1210_v61 = vsel %vm3757_vm15, %v3756_v26, %v3755_v25  ;;  %v1211_v52 = vsel %vm1061_vm3, %v2754_v10, %v3758_v31  ;;  %v1212_v12 = vsel %vm3760_vm2, %v3670_v24, %v3759_v54  ;;  %v3761_v11 = vld [vmem:[#allocation54_spill] sm:$0xff]  ;;  %v3762_v4 = vld [vmem:[#allocation28_spill] sm:$0xff]  ;;  %v3764_v35 = vld [vmem:[#allocation55_spill] sm:$0xff]  ;;  %1282 = vst [vmem:[#allocation2 + $0x178] sm:$0xff] %v1207_v56  ;;  %vm3769_vm3 = vcmp.gt.f32.partialorder %v3680_v3, 0.0 }
 0x217   :  { %vm3763_vm6 = vcmp.gt.f32.partialorder %v3762_v4, 0.0  ;;  %v3765_v49 = vld [vmem:[#allocation32_spill] sm:$0xff]  ;;  %1283 = vst [vmem:[#allocation2 + $0x180] sm:$0xff] %v1208_v8  ;;  %1284 = vst [vmem:[#allocation2 + $0x188] sm:$0xff] %v1209_v34  ;;  %v3767_v10 = vld [vmem:[#allocation26_spill] sm:$0xff]  ;;  %vm3789_vm15 = vcmp.gt.f32.partialorder %v3701_v21, 0.0 }
 0x218   :  { %v1213_v29 = vsel %vm3763_vm6, %v3762_v4, %v3761_v11  ;;  %vm3766_vm10 = vcmp.gt.f32.partialorder %v3765_v49, 0.0  ;;  %1285 = vst [vmem:[#allocation2 + $0x190] sm:$0xff] %v1210_v61  ;;  %v1215_v24 = vsel %vm1065_vm4, %v3676_v14, %v3767_v10  ;;  %v3768_v59 = vld [vmem:[#allocation27_spill] sm:$0xff]  ;;  %v3772_v42 = vld [vmem:[#allocation30_spill] sm:$0xff]  ;;  %1286 = vst [vmem:[#allocation2 + $0x198] sm:$0xff] %v1211_v52  ;;  %vm3777_vm4 = vcmp.gt.f32.partialorder %v3689_v30, 0.0 }
 0x219   :  { %v1214_v27 = vsel %vm3766_vm10, %v3765_v49, %v3764_v35  ;;  %v1216_v18 = vsel %vm3769_vm3, %v3680_v3, %v3768_v59  ;;  %v3770_v58 = vld [vmem:[#allocation31_spill] sm:$0xff]  ;;  %v3773_v48 = vld [vmem:[#allocation6_spill] sm:$0xff]  ;;  %1287 = vst [vmem:[#allocation2 + $0x1a0] sm:$0xff] %v1212_v12  ;;  %1288 = vst [vmem:[#allocation2 + $0x1a8] sm:$0xff] %v1213_v29  ;;  %vm3791_vm2 = vcmp.gt.f32.partialorder %v3703_v22, 0.0  ;;  %vm3794_vm6 = vcmp.gt.f32.partialorder %v3708_v62, 0.0 }
 0x21a   :  { %v1217_v16 = vsel %vm3771_vm0, %v3682_v33, %v3770_v58  ;;  %vm3774_vm14 = vcmp.gt.f32.partialorder %v3773_v48, 0.0  ;;  %1289 = vst [vmem:[#allocation2 + $0x1b0] sm:$0xff] %v1214_v27  ;;  %v3775_v14 = vld [vmem:[#allocation35_spill] sm:$0xff]  ;;  %v3776_v3 = vld [vmem:[#allocation40_spill] sm:$0xff]  ;;  %v3781_v36 = vld [vmem:[#allocation5_spill] sm:$0xff]  ;;  %vm3796_vm10 = vcmp.gt.f32.partialorder %v3710_v41, 0.0 }
 0x21b   :  { %v1218_v13 = vsel %vm3774_vm14, %v3773_v48, %v3772_v42  ;;  %v1219_v17 = vsel %vm1069_vm5, %v3687_v7, %v3775_v14  ;;  %v1220_v53 = vsel %vm3777_vm4, %v3689_v30, %v3776_v3  ;;  %v3778_v33 = vld [vmem:[#allocation8_spill] sm:$0xff]  ;;  %v3779_v0 = vld [vmem:[#allocation7_spill] sm:$0xff]  ;;  %v3782_v63 = vld [vmem:[#allocation10_spill] sm:$0xff]  ;;  %1290 = vst [vmem:[#allocation2 + $0x1b8] sm:$0xff] %v1215_v24  ;;  %vm3785_vm5 = vcmp.gt.f32.partialorder %v3696_v9, 0.0 }
 0x21c   :  { %vm3780_vm8 = vcmp.gt.f32.partialorder %v3779_v0, 0.0  ;;  %vm3783_vm1 = vcmp.gt.f32.partialorder %v3782_v63, 0.0  ;;  %1291 = vst [vmem:[#allocation2 + $0x1c0] sm:$0xff] %v1216_v18  ;;  %1292 = vst [vmem:[#allocation2 + $0x1c8] sm:$0xff] %v1217_v16  ;;  %v3784_v7 = vld [vmem:[#allocation25_spill] sm:$0xff]  ;;  %v3786_v30 = vld [vmem:[#allocation12_spill] sm:$0xff] }
 0x21d   :  { %v1221_v57 = vsel %vm3780_vm8, %v3779_v0, %v3778_v33  ;;  %v1222_v39 = vsel %vm3783_vm1, %v3782_v63, %v3781_v36  ;;  %1293 = vst [vmem:[#allocation2 + $0x1d0] sm:$0xff] %v1218_v13  ;;  %v1223_v38 = vsel %vm3785_vm5, %v3696_v9, %v3784_v7  ;;  %v1224_v37 = vsel %vm3787_vm13, %v3698_v51, %v3786_v30  ;;  %v3788_v1 = vld [vmem:[#allocation9_spill] sm:$0xff]  ;;  %v3792_v9 = vld [vmem:[#allocation11_spill] sm:$0xff]  ;;  %v3793_v20 = vld [vmem:[#allocation14_spill] sm:$0xff] }
 0x21e   :  { %v1225_v32 = vsel %vm3789_vm15, %v3701_v21, %v3788_v1  ;;  %v3790_v2 = vld [vmem:[#allocation41_spill] sm:$0xff]  ;;  %1294 = vst [vmem:[#allocation2 + $0x1d8] sm:$0xff] %v1219_v17  ;;  %1295 = vst [vmem:[#allocation2 + $0x1e0] sm:$0xff] %v1220_v53  ;;  %v1227_v51 = vsel %vm1077_vm7, %v3705_v6, %v3792_v9  ;;  %v1228_v21 = vsel %vm3794_vm6, %v3708_v62, %v3793_v20  ;;  %v3795_v43 = vld [vmem:[#allocation16_spill] sm:$0xff]  ;;  %vm3798_vm3 = vcmp.gt.f32.partialorder %v3712_v5, 0.0 }
 0x21f   :  { %v1226_v50 = vsel %vm3791_vm2, %v3703_v22, %v3790_v2  ;;  %1296 = vst [vmem:[#allocation2 + $0x1e8] sm:$0xff] %v1221_v57  ;;  %1297 = vst [vmem:[#allocation2 + $0x1f0] sm:$0xff] %v1222_v39  ;;  %v1229_v22 = vsel %vm3796_vm10, %v3710_v41, %v3795_v43  ;;  %v3797_v46 = vld [vmem:[#allocation29_spill] sm:$0xff]  ;;  %v1231_v6 = vsel %vm1081_vm11, %v3714_v44, %v3177_v47 }
 0x220   :  { %v1230_v40 = vsel %vm3798_vm3, %v3712_v5, %v3797_v46  ;;  %1298 = vst [vmem:[#allocation2 + $0x1f8] sm:$0xff] %v1223_v38  ;;  %1299 = vst [vmem:[#allocation2 + $0x200] sm:$0xff] %v1224_v37  ;;  %v1232_v41 = vsel %vm1082_vm9, %v3715_v15, %v3180_v19  ;;  %v1234_v5 = vsel %vm1084_vm12, %v3716_v23, %v3183_v28 }
 0x221   :  { %1300 = vst [vmem:[#allocation2 + $0x208] sm:$0xff] %v1225_v32  ;;  %1301 = vst [vmem:[#allocation2 + $0x210] sm:$0xff] %v1226_v50 }
 0x222   :  { %1302 = vst [vmem:[#allocation2 + $0x218] sm:$0xff] %v1227_v51  ;;  %1303 = vst [vmem:[#allocation2 + $0x220] sm:$0xff] %v1228_v21 }
 0x223   :  { %1304 = vst [vmem:[#allocation2 + $0x228] sm:$0xff] %v1229_v22  ;;  %1305 = vst [vmem:[#allocation2 + $0x230] sm:$0xff] %v1230_v40 }
 0x224   :  { %1306 = vst [vmem:[#allocation2 + $0x238] sm:$0xff] %v1231_v6  ;;  %1307 = vst [vmem:[#allocation2 + $0x240] sm:$0xff] %v1232_v41 }
 0x225   :  { %1309 = vst [vmem:[#allocation2 + $0x250] sm:$0xff] %v1234_v5 }
 0x226   :  { %1524 = shalt.err (!%p1521_p4)
}
 0x227   :  { %s1525_s7 = scalar_lea.hbm %s3423_s4, 9600 }
 0x228   :  { %p1526_p5 = scmp.ne.s32.totalorder %s3423_s4, %s1525_s7  ;;  %p1529_p6 = scmp.lt.u32.totalorder %s1525_s7, %s3423_s4 }
 0x22a   :  { %p1531_p7 = pnand %p1529_p6, %p1526_p5 }
 0x22c   :  { %1534 = shalt.err (!%p1531_p7)
}
 0x22d   :  { %s1538_s12 = smov 128   ;;  %s1539_s13 = smov 8  }
 0x22e   :  { %1321 = dma.vmem_to_hbm [thread:$0]  %s3372_s3, 9600, %s3423_s4, [#allocation3], %s1538_s12, %s1538_s12, %s1539_s13  }
 0x22f   :  { %1535 = dma.done.wait [#allocation3], 9600  }
 0x230   :  { %1536 = vsyncadd [#allocation3], 4294957696 }
 0x231   :  { %1325 = vsyncpa [#allocation3], 1 }

</bundles_post_ra>
